<compile_context>
chip_gen: v7x
topology: tpu7x:2x2x1
jax: 0.10.0
libtpu: 0.0.40
codegen_flags: <defaults>
</compile_context>

<pallas_src>
import functools

import jax
import jax.numpy as jnp
from jax.experimental import pallas as pl
from jax.experimental.pallas import tpu as pltpu


def _round_up(x, m):
    return ((x + m - 1) // m) * m


def _pick_tile(n, candidates):
    for c in candidates:
        if c <= n and n % c == 0:
            return c
    return n


def _vmem_capacity_bytes():
    # Chip-aware tiling; fall back to the smallest real VMEM (v7x, 64 MiB).
    try:
        info = pltpu.get_tpu_info()
        return int(getattr(info, "vmem_capacity_bytes", 64 * 1024 * 1024))
    except Exception:  # pragma: no cover - defensive
        return 64 * 1024 * 1024


def _encoder_kernel(adj_ref, x_ref, w_ref, b_ref, out_ref, acc_ref, *, c_aug, tk):
    # adj_ref: [tm, tk]        raw adjacency tile, bf16 (self-loops included)
    # x_ref:   [n_pad, c_aug]  node features + ones column, bf16 (VMEM-resident)
    # w_ref:   [c_aug, C_pad]  projection weight, f32 (last row zero)
    # b_ref:   [1, C_pad]      bias, f32
    # out_ref: [tm, C_pad]     f32 output tile
    # acc_ref: [tm, c_aug]     f32 accumulator for A @ [X | 1]
    k = pl.program_id(1)

    @pl.when(k == 0)
    def _():
        acc_ref[...] = jnp.zeros_like(acc_ref)

    # Accumulate A @ [X | 1]: bf16 x bf16 on the MXU, f32 accumulate.
    # The appended ones-column makes the row degree fall out of the matmul
    # (no separate VALU/XLU row-sum per step).
    row0 = pl.multiple_of(k * tk, tk)
    x_blk = x_ref[pl.ds(row0, tk), :]
    acc_ref[...] += jnp.dot(adj_ref[...], x_blk, preferred_element_type=jnp.float32)

    @pl.when(k == pl.num_programs(1) - 1)
    def _():
        acc = acc_ref[...]                               # [tm, c_aug] f32
        deg = acc[:, c_aug - 1:c_aug]                    # row degree from ones column
        inv_deg = pl.reciprocal(jnp.maximum(deg, 1.0), approx=False)
        agg = acc * inv_deg                              # mean aggregation
        # Tiny [tm, c_aug] x [c_aug, C_pad] projection; W's last row is zero so
        # the (scaled) degree column contributes nothing.
        out = jnp.dot(agg, w_ref[...], preferred_element_type=jnp.float32) + b_ref[...]
        out_ref[...] = out.astype(out_ref.dtype)


def encoder_forward(x, edge_index, weight, bias):
    """x: [N, C_in] f32, edge_index: [2, E] i32, weight: [C_in, C_hid], bias: [C_hid]."""
    n, c_in = x.shape
    c_hid = weight.shape[1]
    c_aug = c_in + 1                       # features + ones column (degree)

    # Pad node axis to a multiple of 512 so the tile picker never falls back to
    # tiny tiles; pad output channels to 128 for unmasked full-width stores.
    n_pad = _round_up(max(n, 8), 512)
    c_out_pad = _round_up(c_hid, 128)

    # --- glue (plain JAX): densify raw adjacency (with self-loops) directly in
    # bf16 (counts are small exact integers) -> half the scatter-buffer bytes
    # and half the O(N^2) HBM stream the kernel reads.
    src = edge_index[0]
    dst = edge_index[1]
    adj = jnp.zeros((n_pad, n_pad), jnp.bfloat16).at[dst, src].add(1.0)
    diag = jnp.arange(n)
    adj = adj.at[diag, diag].add(1.0)      # self-loops for real nodes

    # X augmented with a ones column (degree via MXU); bf16 for the MXU path.
    x_aug = jnp.zeros((n_pad, c_aug), jnp.bfloat16)
    x_aug = x_aug.at[:n, :c_in].set(x.astype(jnp.bfloat16))
    x_aug = x_aug.at[:, c_in].set(1.0)     # padded adj columns are zero, so harmless

    # Weight padded with a zero row (for the ones column) and zero lanes.
    w_aug = jnp.zeros((c_aug, c_out_pad), jnp.float32)
    w_aug = w_aug.at[:c_in, :c_hid].set(weight.astype(jnp.float32))
    b_p = jnp.zeros((1, c_out_pad), jnp.float32).at[0, :c_hid].set(
        bias.astype(jnp.float32))

    # Chip-aware tile sizes / VMEM limit.
    vmem_cap = _vmem_capacity_bytes()
    big_vmem = vmem_cap >= 100 * 1024 * 1024     # v5e / v6e (128 MiB); v7x has 64 MiB
    if n_pad <= 512:
        # Small graphs: keep >= 2 row tiles so the "parallel" axis feeds both
        # v7x TensorCores.
        tm_cands = (256, 128)
    elif big_vmem:
        tm_cands = (1024, 512, 256, 128)
    else:
        tm_cands = (512, 256, 128)
    tm = _pick_tile(n_pad, tm_cands)
    tk = _pick_tile(n_pad, (4096, 2048, 1024, 512, 256, 128))
    vmem_limit = (96 if big_vmem else 48) * 1024 * 1024
    grid = (n_pad // tm, n_pad // tk)

    kernel = functools.partial(_encoder_kernel, c_aug=c_aug, tk=tk)

    out = pl.pallas_call(
        kernel,
        out_shape=jax.ShapeDtypeStruct((n_pad, c_out_pad), jnp.float32),
        grid_spec=pltpu.PrefetchScalarGridSpec(
            num_scalar_prefetch=0,
            grid=grid,
            in_specs=[
                pl.BlockSpec((tm, tk), lambda i, k: (i, k)),            # adj tile (streamed)
                pl.BlockSpec((n_pad, c_aug), lambda i, k: (0, 0)),      # X resident
                pl.BlockSpec((c_aug, c_out_pad), lambda i, k: (0, 0)),  # W resident
                pl.BlockSpec((1, c_out_pad), lambda i, k: (0, 0)),      # bias resident
            ],
            out_specs=pl.BlockSpec((tm, c_out_pad), lambda i, k: (i, 0)),
            scratch_shapes=[
                pltpu.VMEM((tm, c_aug), jnp.float32),   # A @ [X | 1] accumulator
            ],
        ),
        compiler_params=pltpu.CompilerParams(
            dimension_semantics=("parallel", "arbitrary"),
            vmem_limit_bytes=vmem_limit,
        ),
    )(adj, x_aug, w_aug, b_p)

    return out[:n, :c_hid]


def _reference(x, edge_index, weight, bias):
    n = x.shape[0]
    src, dst = edge_index[0], edge_index[1]
    adj = jnp.zeros((n, n), jnp.float32).at[dst, src].add(1.0)
    adj = adj + jnp.eye(n, dtype=jnp.float32)
    adj = adj / jnp.maximum(jnp.sum(adj, axis=1, keepdims=True), 1.0)
    return adj @ (x @ weight) + bias[None, :]


if __name__ == "__main__":
    in_channels = 4
    hidden_channels = 32
    num_nodes = 16
    num_edges = 32

    key = jax.random.PRNGKey(0)
    k_x, k_w, k_b, k_src, k_dst = jax.random.split(key, 5)

    x = jax.random.normal(k_x, (num_nodes, in_channels), dtype=jnp.float32)
    edge_index = jnp.stack(
        [
            jax.random.randint(k_src, (num_edges,), 0, num_nodes, dtype=jnp.int32),
            jax.random.randint(k_dst, (num_edges,), 0, num_nodes, dtype=jnp.int32),
        ],
        axis=0,
    )

    # Deterministic parameter init (synthetic, not a checkpoint load).
    weight = jax.random.normal(k_w, (in_channels, hidden_channels), dtype=jnp.float32) * 0.1
    bias = jax.random.normal(k_b, (hidden_channels,), dtype=jnp.float32) * 0.01

    out = encoder_forward(x, edge_index, weight, bias)
    out = jax.block_until_ready(out)
    assert out.shape == (num_nodes, hidden_channels)

    # Strict check: same math with X rounded through bf16 (only input rounding
    # differs; adjacency counts are exact in bf16 and accumulation is f32).
    ref_bf16_in = _reference(
        x.astype(jnp.bfloat16).astype(jnp.float32), edge_index, weight, bias)
    assert jnp.allclose(out, ref_bf16_in, atol=1e-4, rtol=1e-4)

    # Sanity check against the pure-f32 reference at bf16-activation tolerance.
    ref_f32 = _reference(x, edge_index, weight, bias)
    assert jnp.allclose(out, ref_f32, atol=3e-2, rtol=3e-2)

    print("KERNEL_OK")
</pallas_src>

<mosaic_0001>
module attributes {stable_mosaic.version = 11 : i64} {
  func.func @_encoder_kernel(%arg0: i32, %arg1: i32, %arg2: memref<256x512xbf16, #tpu.memory_space<vmem>>, %arg3: memref<512x5xbf16, #tpu.memory_space<vmem>>, %arg4: memref<5x128xf32, #tpu.memory_space<vmem>>, %arg5: memref<1x128xf32, #tpu.memory_space<vmem>>, %arg6: memref<256x128xf32, #tpu.memory_space<vmem>>, %arg7: memref<256x5xf32, #tpu.memory_space<vmem>>) attributes {dimension_semantics = [#tpu.dimension_semantics<parallel>, #tpu.dimension_semantics<arbitrary>], iteration_bounds = array<i64: 2, 1>, scalar_prefetch = 0 : i64, scratch_operands = 1 : i64, tpu.core_type = #tpu.core_type<tc>, window_params = [{transform_indices = @transform_0, window_bounds = array<i64: 256, 512>}, {pipeline_mode = #tpu.pipeline_mode<synchronous>, transform_indices = @transform_1, window_bounds = array<i64: 512, 5>}, {pipeline_mode = #tpu.pipeline_mode<synchronous>, transform_indices = @transform_2, window_bounds = array<i64: 5, 128>}, {pipeline_mode = #tpu.pipeline_mode<synchronous>, transform_indices = @transform_3, window_bounds = array<i64: 1, 128>}, {transform_indices = @transform_4, window_bounds = array<i64: 256, 128>}]} {
    %c0_i32 = arith.constant 0 : i32
    %0 = arith.cmpi eq, %arg1, %c0_i32 : i32
    %1 = arith.extui %0 : i1 to i32
    %c0_i32_0 = arith.constant 0 : i32
    %2 = arith.cmpi ne, %1, %c0_i32_0 : i32
    scf.if %2 {
      %cst_9 = arith.constant 0.000000e+00 : f32
      %15 = vector.broadcast %cst_9 : f32 to vector<256x5xf32>
      %c0_10 = arith.constant 0 : index
      %c0_11 = arith.constant 0 : index
      %16 = vector.load %arg7[%c0_10, %c0_11] : memref<256x5xf32, #tpu.memory_space<vmem>>, vector<256x5xf32>
      tpu.vector_store %arg7[%c0_10, %c0_11], %15 {strides = array<i32>} : memref<256x5xf32, #tpu.memory_space<vmem>>, vector<256x5xf32>,
    } else {
    }
    %c512_i32 = arith.constant 512 : i32
    %3 = arith.muli %arg1, %c512_i32 : i32
    %4 = tpu.assume_multiple %3, 512 : i32
    %5 = arith.index_cast %4 : i32 to index
    %c0 = arith.constant 0 : index
    %6 = vector.load %arg3[%5, %c0] : memref<512x5xbf16, #tpu.memory_space<vmem>>, vector<512x5xbf16>
    %c0_1 = arith.constant 0 : index
    %c0_2 = arith.constant 0 : index
    %7 = vector.load %arg7[%c0_1, %c0_2] : memref<256x5xf32, #tpu.memory_space<vmem>>, vector<256x5xf32>
    %c0_3 = arith.constant 0 : index
    %c0_4 = arith.constant 0 : index
    %8 = vector.load %arg2[%c0_3, %c0_4] : memref<256x512xbf16, #tpu.memory_space<vmem>>, vector<256x512xbf16>
    %cst = arith.constant dense<0.000000e+00> : vector<256x5xf32>
    %9 = tpu.matmul %8, %6, %cst {dimension_numbers = #tpu.dot_dimension_numbers<[1], [0], [0], [1], [0, 0, 1, 1], [], []>} : vector<256x512xbf16>, vector<512x5xbf16>, vector<256x5xf32> -> vector<256x5xf32>
    %10 = arith.addf %7, %9 : vector<256x5xf32>
    %c0_5 = arith.constant 0 : index
    %c0_6 = arith.constant 0 : index
    %11 = vector.load %arg7[%c0_5, %c0_6] : memref<256x5xf32, #tpu.memory_space<vmem>>, vector<256x5xf32>
    tpu.vector_store %arg7[%c0_5, %c0_6], %10 {strides = array<i32>} : memref<256x5xf32, #tpu.memory_space<vmem>>, vector<256x5xf32>,
    %c0_i32_7 = arith.constant 0 : i32
    %12 = arith.cmpi eq, %arg1, %c0_i32_7 : i32
    %13 = arith.extui %12 : i1 to i32
    %c0_i32_8 = arith.constant 0 : i32
    %14 = arith.cmpi ne, %13, %c0_i32_8 : i32
    scf.if %14 {
      %c0_9 = arith.constant 0 : index
      %c0_10 = arith.constant 0 : index
      %15 = vector.load %arg7[%c0_9, %c0_10] : memref<256x5xf32, #tpu.memory_space<vmem>>, vector<256x5xf32>
      %16 = vector.extract_strided_slice %15 {offsets = [0, 4], sizes = [256, 1], strides = [1, 1]} : vector<256x5xf32> to vector<256x1xf32>
      %cst_11 = arith.constant 1.000000e+00 : f32
      %17 = vector.broadcast %cst_11 : f32 to vector<256x1xf32>
      %18 = arith.maximumf %16, %17 : vector<256x1xf32>
      %19 = tpu.reciprocal %18 : vector<256x1xf32> -> vector<256x1xf32>
      %20 = vector.broadcast %19 : vector<256x1xf32> to vector<256x5xf32>
      %21 = arith.mulf %15, %20 : vector<256x5xf32>
      %c0_12 = arith.constant 0 : index
      %c0_13 = arith.constant 0 : index
      %22 = vector.load %arg4[%c0_12, %c0_13] : memref<5x128xf32, #tpu.memory_space<vmem>>, vector<5x128xf32>
      %cst_14 = arith.constant dense<0.000000e+00> : vector<256x128xf32>
      %23 = tpu.matmul %21, %22, %cst_14 {dimension_numbers = #tpu.dot_dimension_numbers<[1], [0], [0], [1], [0, 0, 1, 1], [], []>} : vector<256x5xf32>, vector<5x128xf32>, vector<256x128xf32> -> vector<256x128xf32>
      %c0_15 = arith.constant 0 : index
      %c0_16 = arith.constant 0 : index
      %24 = vector.load %arg5[%c0_15, %c0_16] : memref<1x128xf32, #tpu.memory_space<vmem>>, vector<1x128xf32>
      %25 = vector.broadcast %24 : vector<1x128xf32> to vector<256x128xf32>
      %26 = arith.addf %23, %25 : vector<256x128xf32>
      %c0_17 = arith.constant 0 : index
      %c0_18 = arith.constant 0 : index
      %27 = vector.load %arg6[%c0_17, %c0_18] : memref<256x128xf32, #tpu.memory_space<vmem>>, vector<256x128xf32>
      tpu.vector_store %arg6[%c0_17, %c0_18], %26 {strides = array<i32>} : memref<256x128xf32, #tpu.memory_space<vmem>>, vector<256x128xf32>,
    } else {
    }
    return
  }
  func.func @transform_0(%arg0: i32, %arg1: i32) -> (i32, i32) {
    %c0_i32 = arith.constant 0 : i32
    return %arg0, %arg1 : i32, i32
  }
  func.func @transform_1(%arg0: i32, %arg1: i32) -> (i32, i32) {
    %c0_i32 = arith.constant 0 : i32
    %c0_i32_0 = arith.constant 0 : i32
    %c0_i32_1 = arith.constant 0 : i32
    return %c0_i32, %c0_i32_0 : i32, i32
  }
  func.func @transform_2(%arg0: i32, %arg1: i32) -> (i32, i32) {
    %c0_i32 = arith.constant 0 : i32
    %c0_i32_0 = arith.constant 0 : i32
    %c0_i32_1 = arith.constant 0 : i32
    return %c0_i32, %c0_i32_0 : i32, i32
  }
  func.func @transform_3(%arg0: i32, %arg1: i32) -> (i32, i32) {
    %c0_i32 = arith.constant 0 : i32
    %c0_i32_0 = arith.constant 0 : i32
    %c0_i32_1 = arith.constant 0 : i32
    return %c0_i32, %c0_i32_0 : i32, i32
  }
  func.func @transform_4(%arg0: i32, %arg1: i32) -> (i32, i32) {
    %c0_i32 = arith.constant 0 : i32
    %c0_i32_0 = arith.constant 0 : i32
    return %arg0, %c0_i32 : i32, i32
  }
}

</mosaic_0001>

<bundles_post_ra>
// kernel: tpu_custom_call.1
= control target key start
LH: loop header
LB: loop body
LE: loop exit
PB: predicated region body
PF: predicated region fallthrough
CT: control target
= control target key end

     0   :  { %9 = vsyncpa [#allocation4], 0  ;;  %s3696_s0 = inlined_call_operand.hbm [shape: bf16[512,512], index: 0, kind: input, shape index: {}]   ;;  %s3697_s1 = inlined_call_operand.vmem [shape: bf16[512,5], index: 1, kind: input, shape index: {}]   ;;  %s3698_s2 = inlined_call_operand.vmem [shape: f32[5,128], index: 2, kind: input, shape index: {}]   ;;  %s3699_s3 = inlined_call_operand.vmem [shape: f32[1,128], index: 3, kind: input, shape index: {}]   ;;  %s3700_s4 = inlined_call_operand.hbm [shape: f32[512,128], index: 4, kind: output, shape index: {}]  }
   0x1   :  { %11 = vsyncpa [#allocation4 + $0x1], 0 }
   0x2   :  { %12 = vsyncpa [#allocation5], 0 }
   0x3   :  { %14 = vsyncpa [#allocation5 + $0x1], 0  ;;  %s2975_s15 = smov 0   ;;  %s2977_s16 = smov 0  }
   0x4   :  { %s2979_s17 = smov 0   ;;  %s2981_s18 = smov 0  }
   0x5   :  { %s2983_s19 = smov 0   ;;  %s2985_s20 = smov 0  }
   0x6 LB: > { %s2094_s21 = sadd.s32 4294967295, %s2940_s20   ;;  %s2095_s22 = sadd.s32 4294967294, %s2940_s20   ;;  %s2940_s20 = sphi %s2985_s20, %s20_s20   ;;  %s2936_s19 = sphi %s2983_s19, %s3715_s19   ;;  %s2932_s18 = sphi %s2981_s18, %s3714_s18   ;;  %s2928_s17 = sphi %s2979_s17, %s3713_s17   ;;  %s2924_s16 = sphi %s2977_s16, %s3712_s16   ;;  %s2920_s15 = sphi %s2975_s15, %s3711_s15  }
   0x7   : > { %s32_s23 = sadd.s32 1, %s2936_s19  ;;  %s41_s24 = sadd.s32 1, %s2928_s17 }
   0x8   : > { %p34_p0 = scmp.ge.s32.totalorder %s32_s23, 2  ;;  %p48_p1 = scmp.ne.s32.totalorder %s2928_s17, %s2924_s16 }
   0x9   : > { %p49_p2 = scmp.eq.s32.totalorder %s2940_s20, 0  ;;  %p54_p3 = scmp.ne.s32.totalorder %s2924_s16, %s2920_s15 }
   0xa   : > { %s3717_s23 = smov (%p34_p0, %s32_s23), 0  ;;  %p55_p5 = scmp.eq.s32.totalorder %s2094_s21, 0 }
   0xb   : > { %p3016_p4 = por %p49_p2, %p48_p1  ;;  %s36_s26 = ssub.s32 %s2936_s19, %s3717_s23 }
   0xc   : > { %p141_p6 = scmp.eq.s32.totalorder %s2094_s21, 1  ;;  %p39_p7 = scmp.eq.s32.totalorder %s36_s26, 0 }
   0xd   : > { %p3022_p8 = por %p55_p5, %p54_p3  ;;  %p147_p10 = scmp.eq.s32.totalorder %s2095_s22, 1 }
   0xe   : > { %p3026_p9 = por %p141_p6, %p48_p1  ;;  %p2578_p13 = scmp.lt.s32.totalorder %s2940_s20, 2 }
   0xf   : > { %s3031_s29 = scalar_select %p39_p7, %s2928_s17, %s41_s24  }
  0x10   : > { %s3704_s28 = scalar_select %p3026_p9, 1, 0 }
  0x11   : > { %p3033_p11 = por %p147_p10, %p54_p3  ;;  %s176_s5 = sand.u32 1, %s2928_s17  }
  0x12   : > { %s2098_s6 = sshll.u32 %s176_s5, 9  ;;  %s2241_s7 = sshll.u32 %s2936_s19, 13 }
  0x13   : > { %s3705_s30 = scalar_select %p3033_p11, 1, 0 }
  0x14   : > { %s3044_s10 = scalar_lea.hbm %s3696_s0, %s2241_s7  ;;  %s180_s11 = scalar_lea.vmem [#allocation3], %s2098_s6 }
  0x15   : > { %s190_s12 = sshll.u32 %s180_s11, 4  ;;  %p3050_p0 = pnand %p2578_p13, %p3016_p4  ;;  %s3046_s12 = int_to_ptr.vmem [resolvable:$true] %s190_s12 }
  0x16   : > { %s3055_s14 = scalar_lea.sflag [#allocation4], %s176_s5  ;;  %s2828_s21 = scalar_lea.hbm %s3044_s10, 8192 }
  0x17   : > { %p2829_p2 = scmp.ne.s32.totalorder %s3044_s10, %s2828_s21  ;;  %p2830_p3 = pneg %p3050_p0 }
  0x18   : > { %s2833_s25 = scalar_lea.hbm %s3696_s0, 16384  ;;  %p2834_p4 = scmp.lt.u32.totalorder %s3044_s10, %s3696_s0 }
  0x19   : > { %p2831_p5 = pnand %p2830_p3, %p2829_p2  ;;  %p2835_p7 = scmp.lt.u32.totalorder %s2833_s25, %s2828_s21 }
  0x1a   : > { %p2837_p13 = scmp.lt.u32.totalorder %s2828_s21, %s3044_s10 }
  0x1b   : > { %p2832_p6 = pneg %p2831_p5  ;;  %p2836_p10 = por %p2835_p7, %p2834_p4 }
  0x1d   : > { %p2838_p12 = por %p2837_p13, %p2836_p10 }
  0x1f   : > { %p2839_p1 = pnand %p2838_p12, %p2832_p6 }
  0x21   : > { %2842 = shalt.err (!%p2839_p1)
}
  0x22   : > { %s2843_s5 = scalar_lea.vmem %s3046_s12, 8192  ;;  %s2942_s7 = smov [#allocation3]  }
  0x23   : > { %p2844_p2 = scmp.ne.s32.totalorder %s3046_s12, %s2843_s5  ;;  %s2848_s8 = sshll.u32 %s2942_s7, 4  ;;  %s2849_s8 = int_to_ptr.vmem [resolvable:$false] %s2848_s8 }
  0x24   : > { %s2850_s9 = scalar_lea.vmem %s2849_s8, 16384  ;;  %p2851_p9 = scmp.lt.s32.totalorder %s3046_s12, %s2849_s8 }
  0x25   : > { %p2846_p5 = pnand %p2844_p2, %p2830_p3  ;;  %p2852_p4 = scmp.lt.s32.totalorder %s2850_s9, %s2843_s5 }
  0x27   : > { %p2847_p11 = pneg %p2846_p5  ;;  %p2853_p7 = por %p2852_p4, %p2851_p9 }
  0x29   : > { %p2854_p10 = pnand %p2853_p7, %p2847_p11 }
  0x2b   : > { %2857 = shalt.err (!%p2854_p10)
}
  0x2c   : > { %s2943_s11 = smov 256   ;;  %s2944_s21 = smov 16  }
  0x2d   : > { %2573 = dma.hbm_to_vmem [thread:$0]  (!%p3050_p0), %s3044_s10, 8192, %s3046_s12, %s3055_s14, %s2943_s11, %s2943_s11, %s2944_s21  }
  0x2e   : > { %p198_p12 = scmp.lt.s32.totalorder %s2940_s20, 3  ;;  %p3707_p1 = scmp.ge.s32.totalorder %s2940_s20, 1 }
  0x30   : > { %p199_p3 = pnand %p3707_p1, %p198_p12 }
  0x31   : > { %s3087_s22 = sand.u32 (!%p199_p3), 1, %s2924_s16  }
  0x32   : > { %202 = sbr.rel (%p199_p3) target bundleno = 845 (0x34d), region = 36  ;;  %s2103_s24 = sshll.u32 (!%p199_p3), %s3087_s22, 9 }
  0x33   : > { %s205_s25 = scalar_lea.sflag (!%p199_p3), [#allocation4], %s3087_s22  ;;  %s3091_s26 = scalar_lea.vmem (!%p199_p3), [#allocation3], %s2103_s24 }
  0x39   : > { %2911 = dma.done.wait (%p3022_p8), %s205_s25, 8192  }
  0x3a   : > { %2913 = vsyncadd (%p3022_p8), %s205_s25, 4294959104  ;;  %v2636_v0 = vld [vmem:[%s3697_s1 + $0x40] sm:$0xff]   ;;  %v2638_v2 = vld [vmem:[%s3697_s1 + $0x48] sm:$0xff]   ;;  %vm241_vm0 = vcmask 39936   ;;  %vm1733_vm1 = vcmask 1044480   ;;  %s2104_s9 = sshll.u32 %s3087_s22, 8 }
  0x3b   : > { %v2637_v1 = vld [vmem:[%s3697_s1] sm:$0xff]   ;;  %2550 = vmatprep.subr.bf16.mxu1 %v2636_v0  ;;  %2243 = vmatprep.subr.bf16.mxu0 %v2636_v0  ;;  %v2639_v3 = vld [vmem:[%s3697_s1 + $0x8] sm:$0xff]   ;;  %v2640_v4 = vld [vmem:[%s3697_s1 + $0x50] sm:$0xff]   ;;  %s3576_s24 = scalar_lea.vmem [#allocation6], %s2104_s9  ;;  %s2242_s25 = sshll.u32 %s2932_s18, 12 }
  0x3c   : > { %2558 = vmatpush3.bf16.msra.mxu1 %v2637_v1  ;;  %2244 = vmatpush3.bf16.msra.mxu0 %v2637_v1  ;;  %v2641_v5 = vld [vmem:[%s3697_s1 + $0x10] sm:$0xff]   ;;  %v2642_v6 = vld [vmem:[%s3697_s1 + $0x58] sm:$0xff]   ;;  %v2644_v8 = vld [vmem:[%s3697_s1 + $0x60] sm:$0xff]   ;;  %s2008_s10 = sshll.u32 %s3576_s24, 4  ;;  %s3642_s14 = scalar_lea.hbm %s3700_s4, %s2242_s25  ;;  %s3644_s10 = int_to_ptr.vmem [resolvable:$true] %s2008_s10 }
  0x3d   : > { %2551 = vmatprep.subr.bf16.mxu1 %v2638_v2  ;;  %2245 = vmatprep.subr.bf16.mxu0 %v2638_v2  ;;  %v2643_v7 = vld [vmem:[%s3697_s1 + $0x18] sm:$0xff]   ;;  %v2645_v9 = vld [vmem:[%s3697_s1 + $0x20] sm:$0xff]   ;;  %v2646_v10 = vld [vmem:[%s3697_s1 + $0x68] sm:$0xff]   ;;  %s1995_s18 = scalar_lea.sflag [#allocation5], %s3087_s22  ;;  %s2858_s6 = scalar_lea.vmem %s3644_s10, 4096 }
  0x3e   : > { %v2654_v11 = vld [vmem:[%s3091_s26 + $0x184] ss:$16 sps:$4 sm:$0xff]   ;;  %v2647_v12 = vld [vmem:[%s3697_s1 + $0x28] sm:$0xff]   ;;  %v2650_v15 = vld [vmem:[%s3697_s1 + $0x78] sm:$0xff]   ;;  %p2859_p8 = scmp.ne.s32.totalorder %s3644_s10, %s2858_s6  ;;  %p3708_p9 = scmp.ne.s32.totalorder %s3704_s28, 0 }
  0x3f   : > { %1079 = vmatprep.mubr.bf16.mxu1 %v2654_v11  ;;  %v2648_v13 = vld [vmem:[%s3697_s1 + $0x70] sm:$0xff]   ;;  %v2651_v16 = vld [vmem:[%s3697_s1 + $0x38] sm:$0xff]   ;;  %v2655_v17 = vld [vmem:[%s3697_s1 + $0xc0] sm:$0xff]   ;;  %s2947_s5 = smov [#allocation6]  }
  0x40   : > { %2559 = vmatpush3.bf16.msra.mxu1 %v2639_v3  ;;  %2246 = vmatpush3.bf16.msra.mxu0 %v2639_v3  ;;  %v2649_v14 = vld [vmem:[%s3697_s1 + $0x30] sm:$0xff]   ;;  %v2656_v19 = vld [vmem:[%s3697_s1 + $0x80] sm:$0xff]   ;;  %v2657_v21 = vld [vmem:[%s3697_s1 + $0xc8] sm:$0xff]   ;;  %p2860_p11 = pnand %p2859_p8, %p3708_p9  ;;  %s2862_s7 = sshll.u32 %s2947_s5, 4  ;;  %s2863_s7 = int_to_ptr.vmem [resolvable:$false] %s2862_s7 }
  0x41   : > { %2552 = vmatprep.subr.bf16.mxu1 %v2640_v4  ;;  %2247 = vmatprep.subr.bf16.mxu0 %v2640_v4  ;;  %v2652_v18 = vld [vmem:[%s3091_s26 + $0x180] ss:$16 sps:$4 sm:$0xff]   ;;  %v2659_v20 = vld [vmem:[%s3091_s26 + $0x1a4] ss:$16 sps:$4 sm:$0xff]   ;;  %v2658_v22 = vld [vmem:[%s3697_s1 + $0x88] sm:$0xff]   ;;  %s2864_s8 = scalar_lea.vmem %s2863_s7, 8192  ;;  %p2865_p6 = scmp.lt.s32.totalorder %s3644_s10, %s2863_s7 }
  0x42   : > { %v2661_v23 = vld [vmem:[%s3091_s26 + $0x1a0] ss:$16 sps:$4 sm:$0xff]   ;;  %v2682_v27 = vld [vmem:[%s3091_s26 + $0x4] ss:$16 sps:$4 sm:$0xff]   ;;  %v2664_v28 = vld [vmem:[%s3697_s1 + $0xd8] sm:$0xff]   ;;  %p2861_p0 = pneg %p2860_p11  ;;  %p2866_p13 = scmp.lt.s32.totalorder %s2864_s8, %s2858_s6 }
  0x43   : > { %v2662_v24 = vld [vmem:[%s3697_s1 + $0xd0] sm:$0xff]   ;;  %983 = vmatprep.mubr.bf16.mxu0 %v2682_v27  ;;  %v2665_v31 = vld [vmem:[%s3697_s1 + $0x98] sm:$0xff]   ;;  %v2669_v33 = vld [vmem:[%s3697_s1 + $0xe0] sm:$0xff]  }
  0x44   : > { %2560 = vmatpush3.bf16.msra.mxu1 %v2641_v5  ;;  %2248 = vmatpush3.bf16.msra.mxu0 %v2641_v5  ;;  %v2663_v25 = vld [vmem:[%s3697_s1 + $0x90] sm:$0xff]   ;;  %v2670_v36 = vld [vmem:[%s3697_s1 + $0xa0] sm:$0xff]   ;;  %v2671_v38 = vld [vmem:[%s3697_s1 + $0xe8] sm:$0xff]   ;;  %p2867_p2 = por %p2866_p13, %p2865_p6 }
  0x45   : > { %2553 = vmatprep.subr.bf16.mxu1 %v2642_v6  ;;  %2249 = vmatprep.subr.bf16.mxu0 %v2642_v6  ;;  %v2680_v26 = vld [vmem:[%s3091_s26] ss:$16 sps:$4 sm:$0xff]   ;;  %v2666_v29 = vld [vmem:[%s3091_s26 + $0x1c4] ss:$16 sps:$4 sm:$0xff]   ;;  %v2672_v39 = vld [vmem:[%s3697_s1 + $0xa8] sm:$0xff]  }
  0x46   : > { %v2686_v30 = vld [vmem:[%s3091_s26 + $0x24] ss:$16 sps:$4 sm:$0xff]   ;;  %v2668_v32 = vld [vmem:[%s3091_s26 + $0x1c0] ss:$16 sps:$4 sm:$0xff]   ;;  %v2685_v45 = vld [vmem:[%s3091_s26 + $0xc] ss:$16 sps:$4 sm:$0xff]   ;;  %p2868_p5 = pnand %p2867_p2, %p2861_p0 }
  0x47   : > { %v2690_v34 = vld [vmem:[%s3091_s26 + $0x20] ss:$16 sps:$4 sm:$0xff]   ;;  %v2692_v35 = vld [vmem:[%s3091_s26 + $0x44] ss:$16 sps:$4 sm:$0xff]   ;;  %v2678_v46 = vld [vmem:[%s3697_s1 + $0xf8] sm:$0xff]  }
  0x48   : > { %2561 = vmatpush3.bf16.msra.mxu1 %v2643_v7  ;;  %2250 = vmatpush3.bf16.msra.mxu0 %v2643_v7  ;;  %v2673_v37 = vld [vmem:[%s3091_s26 + $0x1e4] ss:$16 sps:$4 sm:$0xff]   ;;  %v2675_v40 = vld [vmem:[%s3091_s26 + $0x1e0] ss:$16 sps:$4 sm:$0xff]   ;;  %v2679_v47 = vld [vmem:[%s3697_s1 + $0xb8] sm:$0xff]  }
  0x49   : > { %2554 = vmatprep.subr.bf16.mxu1 %v2644_v8  ;;  %2251 = vmatprep.subr.bf16.mxu0 %v2644_v8  ;;  %v2676_v41 = vld [vmem:[%s3697_s1 + $0xf0] sm:$0xff]   ;;  %v2683_v48 = vld [vmem:[%s3091_s26 + $0x8] ss:$16 sps:$4 sm:$0xff]   ;;  %v2688_v51 = vld [vmem:[%s3091_s26 + $0x2c] ss:$16 sps:$4 sm:$0xff]  }
  0x4a   : > { %v2696_v42 = vld [vmem:[%s3091_s26 + $0x40] ss:$16 sps:$4 sm:$0xff]   ;;  %v2698_v43 = vld [vmem:[%s3091_s26 + $0x64] ss:$16 sps:$4 sm:$0xff]   ;;  %v2691_v53 = vld [vmem:[%s3091_s26 + $0x28] ss:$16 sps:$4 sm:$0xff]  }
  0x4b   : > { %v2677_v44 = vld [vmem:[%s3697_s1 + $0xb0] sm:$0xff]   ;;  %v2694_v55 = vld [vmem:[%s3091_s26 + $0x4c] ss:$16 sps:$4 sm:$0xff]   ;;  %v2697_v57 = vld [vmem:[%s3091_s26 + $0x48] ss:$16 sps:$4 sm:$0xff]  }
  0x4c   : > { %2562 = vmatpush3.bf16.msra.mxu1 %v2645_v9  ;;  %2252 = vmatpush3.bf16.msra.mxu0 %v2645_v9  ;;  %v2702_v49 = vld [vmem:[%s3091_s26 + $0x60] ss:$16 sps:$4 sm:$0xff]   ;;  %v2704_v50 = vld [vmem:[%s3091_s26 + $0x84] ss:$16 sps:$4 sm:$0xff]   ;;  %v2700_v59 = vld [vmem:[%s3091_s26 + $0x6c] ss:$16 sps:$4 sm:$0xff]  }
  0x4d   : > { %2555 = vmatprep.subr.bf16.mxu1 %v2646_v10  ;;  %2253 = vmatprep.subr.bf16.mxu0 %v2646_v10  ;;  %v2708_v52 = vld [vmem:[%s3091_s26 + $0x80] ss:$16 sps:$4 sm:$0xff]   ;;  %v2710_v54 = vld [vmem:[%s3091_s26 + $0xa4] ss:$16 sps:$4 sm:$0xff]   ;;  %v2703_v61 = vld [vmem:[%s3091_s26 + $0x68] ss:$16 sps:$4 sm:$0xff]  }
  0x4e   : > { %v2714_v56 = vld [vmem:[%s3091_s26 + $0xa0] ss:$16 sps:$4 sm:$0xff]   ;;  %v2716_v58 = vld [vmem:[%s3091_s26 + $0xc4] ss:$16 sps:$4 sm:$0xff]   ;;  %v2706_v63 = vld [vmem:[%s3091_s26 + $0x8c] ss:$16 sps:$4 sm:$0xff]  }
  0x4f   : > { %v2720_v60 = vld [vmem:[%s3091_s26 + $0xc0] ss:$16 sps:$4 sm:$0xff]   ;;  %v2722_v62 = vld [vmem:[%s3091_s26 + $0xe4] ss:$16 sps:$4 sm:$0xff]   ;;  %v2709_v1 = vld [vmem:[%s3091_s26 + $0x88] ss:$16 sps:$4 sm:$0xff]  }
  0x50   : > { %2563 = vmatpush3.bf16.msra.mxu1 %v2647_v12  ;;  %2254 = vmatpush3.bf16.msra.mxu0 %v2647_v12  ;;  %v2726_v0 = vld [vmem:[%s3091_s26 + $0xe0] ss:$16 sps:$4 sm:$0xff]   ;;  %v2728_v2 = vld [vmem:[%s3091_s26 + $0x104] ss:$16 sps:$4 sm:$0xff]   ;;  %v2712_v3 = vld [vmem:[%s3091_s26 + $0xac] ss:$16 sps:$4 sm:$0xff]  }
  0x51   : > { %2556 = vmatprep.subr.bf16.mxu1 %v2648_v13  ;;  %2255 = vmatprep.subr.bf16.mxu0 %v2648_v13  ;;  %v2732_v4 = vld [vmem:[%s3091_s26 + $0x100] ss:$16 sps:$4 sm:$0xff]   ;;  %v2715_v5 = vld [vmem:[%s3091_s26 + $0xa8] ss:$16 sps:$4 sm:$0xff]   ;;  %v2734_v6 = vld [vmem:[%s3091_s26 + $0x124] ss:$16 sps:$4 sm:$0xff]  }
  0x52   : > { %v2718_v7 = vld [vmem:[%s3091_s26 + $0xcc] ss:$16 sps:$4 sm:$0xff]   ;;  %v2738_v8 = vld [vmem:[%s3091_s26 + $0x120] ss:$16 sps:$4 sm:$0xff]   ;;  %v2721_v9 = vld [vmem:[%s3091_s26 + $0xc8] ss:$16 sps:$4 sm:$0xff]  }
  0x53   : > { %v2740_v10 = vld [vmem:[%s3091_s26 + $0x144] ss:$16 sps:$4 sm:$0xff]   ;;  %v2724_v11 = vld [vmem:[%s3091_s26 + $0xec] ss:$16 sps:$4 sm:$0xff]   ;;  %v2744_v12 = vld [vmem:[%s3091_s26 + $0x140] ss:$16 sps:$4 sm:$0xff]  }
  0x54   : > { %2564 = vmatpush3.bf16.msra.mxu1 %v2649_v14  ;;  %2256 = vmatpush3.bf16.msra.mxu0 %v2649_v14  ;;  %v2727_v13 = vld [vmem:[%s3091_s26 + $0xe8] ss:$16 sps:$4 sm:$0xff]   ;;  %v2746_v14 = vld [vmem:[%s3091_s26 + $0x164] ss:$16 sps:$4 sm:$0xff]   ;;  %v2755_v27 = vld [vmem:[%s3091_s26 + $0x1ac] ss:$16 sps:$4 sm:$0xff]  }
  0x55   : > { %2557 = vmatprep.subr.bf16.mxu1 %v2650_v15  ;;  %2257 = vmatprep.subr.bf16.mxu0 %v2650_v15  ;;  %v2730_v15 = vld [vmem:[%s3091_s26 + $0x10c] ss:$16 sps:$4 sm:$0xff]  }
  0x58   : > { %2565 = vmatpush3.bf16.msra.mxu1 %v2651_v16  ;;  %2258 = vmatpush3.bf16.msra.mxu0 %v2651_v16  ;;  %v2750_v16 = vld [vmem:[%s3091_s26 + $0x160] ss:$16 sps:$4 sm:$0xff]  }
  0x59   : > { %2355 = vmatprep.subr.bf16.mxu1 %v2655_v17  ;;  %v2733_v17 = vld [vmem:[%s3091_s26 + $0x108] ss:$16 sps:$4 sm:$0xff]  }
  0x5b   : > { %1080 = vmatmul.mubr.bf16.vlgmr.msra.gmra.mrb[0].mxu1 %v2652_v18  ;;  %984 = vmatmul.mubr.bf16.vlgmr.msra.gmra.mrb[0].mxu0 %v2680_v26  ;;  %v2736_v18 = vld [vmem:[%s3091_s26 + $0x12c] ss:$16 sps:$4 sm:$0xff]   ;;  %v2754_v26 = vld [vmem:[%s3091_s26 + $0x188] ss:$16 sps:$4 sm:$0xff]  }
  0x5c   : > { %2356 = vmatpush3.bf16.msra.mxu1 %v2656_v19  ;;  %1087 = vmatprep.mubr.bf16.mxu1 %v2659_v20  ;;  %v2739_v19 = vld [vmem:[%s3091_s26 + $0x128] ss:$16 sps:$4 sm:$0xff]   ;;  %v2742_v20 = vld [vmem:[%s3091_s26 + $0x14c] ss:$16 sps:$4 sm:$0xff]  }
  0x5d   : > { %2357 = vmatprep.subr.bf16.mxu1 %v2657_v21  ;;  %991 = vmatprep.mubr.bf16.mxu0 %v2686_v30  ;;  %v2745_v21 = vld [vmem:[%s3091_s26 + $0x148] ss:$16 sps:$4 sm:$0xff]  }
  0x5e   : > { %v2760_v30 = vld [vmem:[%s3091_s26 + $0x1c8] ss:$16 sps:$4 sm:$0xff]  }
  0x60   : > { %2358 = vmatpush3.bf16.msra.mxu1 %v2658_v22  ;;  %v2748_v22 = vld [vmem:[%s3091_s26 + $0x16c] ss:$16 sps:$4 sm:$0xff]  }
  0x61   : > { %2359 = vmatprep.subr.bf16.mxu1 %v2662_v24  ;;  %v2751_v24 = vld [vmem:[%s3091_s26 + $0x168] ss:$16 sps:$4 sm:$0xff]  }
  0x63   : > { %1088 = vmatmul.mubr.bf16.gmra.mrb[4].mxu1 %v2661_v23  ;;  %992 = vmatmul.mubr.bf16.gmra.mrb[4].mxu0 %v2690_v34  ;;  %v2945_v23 = vmov 0.0  }
  0x64   : > { %2360 = vmatpush3.bf16.msra.mxu1 %v2663_v25  ;;  %1095 = vmatprep.mubr.bf16.mxu1 %v2666_v29  ;;  %242 = vst.msk [vmem:[#allocation2] sm:$0xff] %vm241_vm0, %v2945_v23  ;;  %243 = vst.msk [vmem:[#allocation2 + $0x8] sm:$0xff] %vm241_vm0, %v2945_v23  ;;  %v2752_v25 = vld [vmem:[%s3091_s26 + $0x18c] ss:$16 sps:$4 sm:$0xff]  }
  0x65   : > { %2361 = vmatprep.subr.bf16.mxu1 %v2664_v28  ;;  %999 = vmatprep.mubr.bf16.mxu0 %v2692_v35  ;;  %244 = vst.msk [vmem:[#allocation2 + $0x10] sm:$0xff] %vm241_vm0, %v2945_v23  ;;  %245 = vst.msk [vmem:[#allocation2 + $0x18] sm:$0xff] %vm241_vm0, %v2945_v23  ;;  %v2757_v28 = vld [vmem:[%s3091_s26 + $0x1a8] ss:$16 sps:$4 sm:$0xff]   ;;  %v2758_v29 = vld [vmem:[%s3091_s26 + $0x1cc] ss:$16 sps:$4 sm:$0xff]  }
  0x66   : > { %246 = vst.msk [vmem:[#allocation2 + $0x20] sm:$0xff] %vm241_vm0, %v2945_v23  ;;  %247 = vst.msk [vmem:[#allocation2 + $0x28] sm:$0xff] %vm241_vm0, %v2945_v23 }
  0x67   : > { %248 = vst.msk [vmem:[#allocation2 + $0x30] sm:$0xff] %vm241_vm0, %v2945_v23  ;;  %249 = vst.msk [vmem:[#allocation2 + $0x38] sm:$0xff] %vm241_vm0, %v2945_v23 }
  0x68   : > { %2362 = vmatpush3.bf16.msra.mxu1 %v2665_v31  ;;  %250 = vst.msk [vmem:[#allocation2 + $0x40] sm:$0xff] %vm241_vm0, %v2945_v23  ;;  %251 = vst.msk [vmem:[#allocation2 + $0x48] sm:$0xff] %vm241_vm0, %v2945_v23  ;;  %v2761_v31 = vld [vmem:[%s3091_s26 + $0x1ec] ss:$16 sps:$4 sm:$0xff]  }
  0x69   : > { %2363 = vmatprep.subr.bf16.mxu1 %v2669_v33  ;;  %252 = vst.msk [vmem:[#allocation2 + $0x50] sm:$0xff] %vm241_vm0, %v2945_v23  ;;  %253 = vst.msk [vmem:[#allocation2 + $0x58] sm:$0xff] %vm241_vm0, %v2945_v23  ;;  %v2763_v33 = vld [vmem:[%s3091_s26 + $0x1e8] ss:$16 sps:$4 sm:$0xff]  }
  0x6a   : > { %254 = vst.msk [vmem:[#allocation2 + $0x60] sm:$0xff] %vm241_vm0, %v2945_v23  ;;  %255 = vst.msk [vmem:[#allocation2 + $0x68] sm:$0xff] %vm241_vm0, %v2945_v23 }
  0x6b   : > { %1096 = vmatmul.mubr.bf16.gmra.mrb[8].mxu1 %v2668_v32  ;;  %1000 = vmatmul.mubr.bf16.gmra.mrb[8].mxu0 %v2696_v42  ;;  %256 = vst.msk [vmem:[#allocation2 + $0x70] sm:$0xff] %vm241_vm0, %v2945_v23  ;;  %257 = vst.msk [vmem:[#allocation2 + $0x78] sm:$0xff] %vm241_vm0, %v2945_v23  ;;  %v2946_v32 = vmov 4  }
  0x6c   : > { %2364 = vmatpush3.bf16.msra.mxu1 %v2670_v36  ;;  %1103 = vmatprep.mubr.bf16.mxu1 %v2673_v37  ;;  %258 = vst.msk [vmem:[#allocation2 + $0x80] sm:$0xff] %vm241_vm0, %v2945_v23  ;;  %259 = vst.msk [vmem:[#allocation2 + $0x88] sm:$0xff] %vm241_vm0, %v2945_v23 }
  0x6d   : > { %2365 = vmatprep.subr.bf16.mxu1 %v2671_v38  ;;  %1007 = vmatprep.mubr.bf16.mxu0 %v2698_v43  ;;  %260 = vst.msk [vmem:[#allocation2 + $0x90] sm:$0xff] %vm241_vm0, %v2945_v23  ;;  %261 = vst.msk [vmem:[#allocation2 + $0x98] sm:$0xff] %vm241_vm0, %v2945_v23 }
  0x6e   : > { %262 = vst.msk [vmem:[#allocation2 + $0xa0] sm:$0xff] %vm241_vm0, %v2945_v23  ;;  %263 = vst.msk [vmem:[#allocation2 + $0xa8] sm:$0xff] %vm241_vm0, %v2945_v23  ;;  %2634 = vset.pattern.permute.xlu0 %v2946_v32  ;;  %2635 = vset.pattern.permute.xlu1 %v2946_v32 }
  0x6f   : > { %264 = vst.msk [vmem:[#allocation2 + $0xb0] sm:$0xff] %vm241_vm0, %v2945_v23  ;;  %265 = vst.msk [vmem:[#allocation2 + $0xb8] sm:$0xff] %vm241_vm0, %v2945_v23 }
  0x70   : > { %2366 = vmatpush3.bf16.msra.mxu1 %v2672_v39  ;;  %266 = vst.msk [vmem:[#allocation2 + $0xc0] sm:$0xff] %vm241_vm0, %v2945_v23  ;;  %267 = vst.msk [vmem:[#allocation2 + $0xc8] sm:$0xff] %vm241_vm0, %v2945_v23 }
  0x71   : > { %2367 = vmatprep.subr.bf16.mxu1 %v2676_v41  ;;  %268 = vst.msk [vmem:[#allocation2 + $0xd0] sm:$0xff] %vm241_vm0, %v2945_v23  ;;  %269 = vst.msk [vmem:[#allocation2 + $0xd8] sm:$0xff] %vm241_vm0, %v2945_v23 }
  0x72   : > { %270 = vst.msk [vmem:[#allocation2 + $0xe0] sm:$0xff] %vm241_vm0, %v2945_v23  ;;  %271 = vst.msk [vmem:[#allocation2 + $0xe8] sm:$0xff] %vm241_vm0, %v2945_v23 }
  0x73   : > { %1104 = vmatmul.mubr.bf16.gmra.mrb[12].mxu1 %v2675_v40  ;;  %1008 = vmatmul.mubr.bf16.gmra.mrb[12].mxu0 %v2702_v49  ;;  %272 = vst.msk [vmem:[#allocation2 + $0xf0] sm:$0xff] %vm241_vm0, %v2945_v23  ;;  %273 = vst.msk [vmem:[#allocation2 + $0xf8] sm:$0xff] %vm241_vm0, %v2945_v23 }
  0x74   : > { %2368 = vmatpush3.bf16.msra.mxu1 %v2677_v44  ;;  %1144 = vmatprep.mubr.bf16.mxu1 %v2685_v45 }
  0x75   : > { %2369 = vmatprep.subr.bf16.mxu1 %v2678_v46  ;;  %1015 = vmatprep.mubr.bf16.mxu0 %v2704_v50 }
  0x78   : > { %2370 = vmatpush3.bf16.msra.mxu1 %v2679_v47 }
  0x7b   : > { %1145 = vmatmul.mubr.bf16.vlgmr.msra.gmra.mrb[16].mxu1 %v2683_v48  ;;  %1016 = vmatmul.mubr.bf16.gmra.mrb[16].mxu0 %v2708_v52 }
  0x7c   : > { %1152 = vmatprep.mubr.bf16.mxu1 %v2688_v51  ;;  %1023 = vmatprep.mubr.bf16.mxu0 %v2710_v54 }
  0x83   : > { %1153 = vmatmul.mubr.bf16.gmra.mrb[20].mxu1 %v2691_v53  ;;  %1024 = vmatmul.mubr.bf16.gmra.mrb[20].mxu0 %v2714_v56 }
  0x84   : > { %1160 = vmatprep.mubr.bf16.mxu1 %v2694_v55  ;;  %1031 = vmatprep.mubr.bf16.mxu0 %v2716_v58 }
  0x8b   : > { %1161 = vmatmul.mubr.bf16.gmra.mrb[24].mxu1 %v2697_v57  ;;  %1032 = vmatmul.mubr.bf16.gmra.mrb[24].mxu0 %v2720_v60 }
  0x8c   : > { %1168 = vmatprep.mubr.bf16.mxu1 %v2700_v59  ;;  %1039 = vmatprep.mubr.bf16.mxu0 %v2722_v62 }
  0x93   : > { %1169 = vmatmul.mubr.bf16.gmra.mrb[28].mxu1 %v2703_v61  ;;  %1040 = vmatmul.mubr.bf16.gmra.mrb[28].mxu0 %v2726_v0 }
  0x94   : > { %1176 = vmatprep.mubr.bf16.mxu1 %v2706_v63  ;;  %1047 = vmatprep.mubr.bf16.mxu0 %v2728_v2 }
  0x9b   : > { %1177 = vmatmul.mubr.bf16.gmra.mrb[32].mxu1 %v2709_v1  ;;  %1048 = vmatmul.mubr.bf16.gmra.mrb[32].mxu0 %v2732_v4 }
  0x9c   : > { %1184 = vmatprep.mubr.bf16.mxu1 %v2712_v3  ;;  %1055 = vmatprep.mubr.bf16.mxu0 %v2734_v6 }
  0xa3   : > { %1185 = vmatmul.mubr.bf16.gmra.mrb[36].mxu1 %v2715_v5  ;;  %1056 = vmatmul.mubr.bf16.gmra.mrb[36].mxu0 %v2738_v8 }
  0xa4   : > { %1192 = vmatprep.mubr.bf16.mxu1 %v2718_v7  ;;  %1063 = vmatprep.mubr.bf16.mxu0 %v2740_v10 }
  0xab   : > { %1193 = vmatmul.mubr.bf16.gmra.mrb[40].mxu1 %v2721_v9  ;;  %1064 = vmatmul.mubr.bf16.gmra.mrb[40].mxu0 %v2744_v12 }
  0xac   : > { %1200 = vmatprep.mubr.bf16.mxu1 %v2724_v11  ;;  %1071 = vmatprep.mubr.bf16.mxu0 %v2746_v14 }
  0xb3   : > { %1201 = vmatmul.mubr.bf16.gmra.mrb[44].mxu1 %v2727_v13  ;;  %1072 = vmatmul.mubr.bf16.gmra.mrb[44].mxu0 %v2750_v16 }
  0xb4   : > { %1208 = vmatprep.mubr.bf16.mxu1 %v2730_v15 }
  0xbb   : > { %1209 = vmatmul.mubr.bf16.gmra.mrb[48].mxu1 %v2733_v17 }
  0xbc   : > { %1216 = vmatprep.mubr.bf16.mxu1 %v2736_v18 }
  0xc3   : > { %1217 = vmatmul.mubr.bf16.gmra.mrb[52].mxu1 %v2739_v19 }
  0xc4   : > { %1224 = vmatprep.mubr.bf16.mxu1 %v2742_v20 }
  0xcb   : > { %1225 = vmatmul.mubr.bf16.gmra.mrb[56].mxu1 %v2745_v21  ;;  %v1629_v21 = vld [vmem:[%s3698_s2] sm:$0x1f] }
  0xcc   : > { %1232 = vmatprep.mubr.bf16.mxu1 %v2748_v22  ;;  %v343_v22 = vld [vmem:[#allocation2] sm:$0xff]  ;;  %2500 = vmatprep.subr.msk.mxu0 %vm1733_vm1, %v1629_v21 }
  0xcd   : > { %2501 = vmatpush3.msk.msra.mxu0 %vm1733_vm1, %v1629_v21 }
  0xd3   : > { %1233 = vmatmul.mubr.bf16.gmra.mrb[60].mxu1 %v2751_v24 }
  0xd4   : > { %1240 = vmatprep.mubr.bf16.mxu1 %v2752_v25 }
  0xdb   : > { %1241 = vmatmul.mubr.bf16.gmra.mrb[64].mxu1 %v2754_v26 }
  0xdc   : > { %1248 = vmatprep.mubr.bf16.mxu1 %v2755_v27  ;;  %v344_v27 = vld [vmem:[#allocation2 + $0x8] sm:$0xff] }
  0xe3   : > { %1249 = vmatmul.mubr.bf16.gmra.mrb[68].mxu1 %v2757_v28 }
  0xe4   : > { %1256 = vmatprep.mubr.bf16.mxu1 %v2758_v29 }
  0xeb   : > { %1257 = vmatmul.mubr.bf16.gmra.mrb[72].mxu1 %v2760_v30 }
  0xec   : > { %1264 = vmatprep.mubr.bf16.mxu1 %v2761_v31 }
  0xf3   : > { %1265 = vmatmul.mubr.bf16.gmra.mrb[76].mxu1 %v2763_v33 }
 0x12e   : > { %v2331_v34 = vpop.f32.mrb[0].mxu1  ;;  %v2259_v40 = vpop.f32.mrb[0].mxu0 }
 0x12f   : > { %v2332_v35 = vpop.f32.mrb[1].mxu1  ;;  %v2260_v42 = vpop.f32.mrb[1].mxu0 }
 0x130   : > { %v3289_v36 = vadd.f32 %v2332_v35, %v2331_v34  ;;  %v2334_v37 = vpop.f32.mrb[2].mxu1  ;;  %v2261_v44 = vadd.f32 %v2260_v42, %v2259_v40  ;;  %v2262_v45 = vpop.f32.mrb[2].mxu0  ;;  %v345_v42 = vld [vmem:[#allocation2 + $0x10] sm:$0xff] }
 0x131   : > { %v2335_v38 = vpop.f32.mrb[3].mxu1  ;;  %v2263_v48 = vpop.f32.mrb[3].mxu0 }
 0x132   : > { %v3291_v39 = vadd.f32 %v2335_v38, %v2334_v37  ;;  %v2264_v50 = vadd.f32 %v2263_v48, %v2262_v45  ;;  %v346_v48 = vld [vmem:[#allocation2 + $0x18] sm:$0xff] }
 0x136   : > { %v2337_v41 = vpop.f32.mrb[4].mxu1  ;;  %v2265_v52 = vpop.f32.mrb[4].mxu0 }
 0x137   : > { %v2338_v43 = vpop.f32.mrb[5].mxu1  ;;  %v2266_v54 = vpop.f32.mrb[5].mxu0 }
 0x138   : > { %v3293_v46 = vadd.f32 %v2338_v43, %v2337_v41  ;;  %v2340_v47 = vpop.f32.mrb[6].mxu1  ;;  %v2267_v56 = vadd.f32 %v2266_v54, %v2265_v52  ;;  %v2268_v57 = vpop.f32.mrb[6].mxu0 }
 0x139   : > { %v2341_v49 = vpop.f32.mrb[7].mxu1  ;;  %v2269_v60 = vpop.f32.mrb[7].mxu0 }
 0x13a   : > { %v3295_v51 = vadd.f32 %v2341_v49, %v2340_v47  ;;  %v2270_v62 = vadd.f32 %v2269_v60, %v2268_v57 }
 0x13e   : > { %v2343_v53 = vpop.f32.mrb[8].mxu1  ;;  %v2271_v0 = vpop.f32.mrb[8].mxu0 }
 0x13f   : > { %v2344_v55 = vpop.f32.mrb[9].mxu1  ;;  %v2272_v2 = vpop.f32.mrb[9].mxu0 }
 0x140   : > { %v3297_v58 = vadd.f32 %v2344_v55, %v2343_v53  ;;  %v2346_v59 = vpop.f32.mrb[10].mxu1  ;;  %v3301_v4 = vadd.f32 %v2272_v2, %v2271_v0  ;;  %v2274_v5 = vpop.f32.mrb[10].mxu0 }
 0x141   : > { %v2347_v61 = vpop.f32.mrb[11].mxu1  ;;  %v2275_v8 = vpop.f32.mrb[11].mxu0 }
 0x142   : > { %v3299_v63 = vadd.f32 %v2347_v61, %v2346_v59  ;;  %v3305_v10 = vadd.f32 %v2275_v8, %v2274_v5  ;;  %v347_v5 = vld [vmem:[#allocation2 + $0x20] sm:$0xff] }
 0x146   : > { %v2349_v1 = vpop.f32.mrb[12].mxu1  ;;  %v2277_v12 = vpop.f32.mrb[12].mxu0 }
 0x147   : > { %v2350_v3 = vpop.f32.mrb[13].mxu1  ;;  %v2278_v14 = vpop.f32.mrb[13].mxu0 }
 0x148   : > { %v3303_v6 = vadd.f32 %v2350_v3, %v2349_v1  ;;  %v2352_v7 = vpop.f32.mrb[14].mxu1  ;;  %v3309_v16 = vadd.f32 %v2278_v14, %v2277_v12  ;;  %v2280_v17 = vpop.f32.mrb[14].mxu0 }
 0x149   : > { %v2353_v9 = vpop.f32.mrb[15].mxu1  ;;  %v2281_v20 = vpop.f32.mrb[15].mxu0 }
 0x14a   : > { %v3307_v11 = vadd.f32 %v2353_v9, %v2352_v7  ;;  %v3314_v24 = vadd.f32 %v2281_v20, %v2280_v17 }
 0x14e   : > { %v2371_v13 = vpop.f32.mrb[16].mxu1  ;;  %v2283_v30 = vpop.f32.mrb[16].mxu0 }
 0x14f   : > { %v2372_v15 = vpop.f32.mrb[17].mxu1  ;;  %v2284_v33 = vpop.f32.mrb[17].mxu0 }
 0x150   : > { %v2373_v18 = vadd.f32 %v2372_v15, %v2371_v13  ;;  %v2374_v19 = vpop.f32.mrb[18].mxu1  ;;  %v3317_v35 = vadd.f32 %v2284_v33, %v2283_v30  ;;  %v2286_v37 = vpop.f32.mrb[18].mxu0  ;;  %v348_v13 = vld [vmem:[#allocation2 + $0x28] sm:$0xff]  ;;  %v349_v30 = vld [vmem:[#allocation2 + $0x30] sm:$0xff] }
 0x151   : > { %v2375_v23 = vpop.f32.mrb[19].mxu1  ;;  %v2287_v41 = vpop.f32.mrb[19].mxu0 }
 0x152   : > { %v1147_v25 = vadd.f32 %v2373_v18, %v2261_v44  ;;  %v2376_v26 = vadd.f32 %v2375_v23, %v2374_v19  ;;  %v3320_v44 = vadd.f32 %v2287_v41, %v2286_v37 }
 0x154   : > { %v1273_v28 = vadd.f32 %v1147_v25, %v343_v22  ;;  %v1150_v29 = vadd.f32 %v2376_v26, %v2264_v50 }
 0x156   : > { %1306 = vst.msk [vmem:[#allocation2] sm:$0xff] %vm241_vm0, %v1273_v28  ;;  %v1274_v31 = vadd.f32 %v1150_v29, %v344_v27  ;;  %v2377_v32 = vpop.f32.mrb[20].mxu1  ;;  %v2289_v53 = vpop.f32.mrb[20].mxu0 }
 0x157   : > { %v2378_v34 = vpop.f32.mrb[21].mxu1  ;;  %v2290_v59 = vpop.f32.mrb[21].mxu0 }
 0x158   : > { %1307 = vst.msk [vmem:[#allocation2 + $0x8] sm:$0xff] %vm241_vm0, %v1274_v31  ;;  %v2379_v38 = vadd.f32 %v2378_v34, %v2377_v32  ;;  %v2380_v40 = vpop.f32.mrb[22].mxu1  ;;  %v3328_v0 = vadd.f32 %v2290_v59, %v2289_v53 }
 0x159   : > { %v2381_v43 = vpop.f32.mrb[23].mxu1 }
 0x15a   : > { %v1155_v45 = vadd.f32 %v2379_v38, %v2267_v56  ;;  %v2382_v47 = vadd.f32 %v2381_v43, %v2380_v40  ;;  %v2292_v56 = vpop.f32.mrb[22].mxu0  ;;  %v350_v38 = vld [vmem:[#allocation2 + $0x38] sm:$0xff] }
 0x15b   : > { %v2293_v3 = vpop.f32.mrb[23].mxu0 }
 0x15c   : > { %v1275_v49 = vadd.f32 %v1155_v45, %v345_v42  ;;  %v1158_v50 = vadd.f32 %v2382_v47, %v2270_v62  ;;  %v3332_v8 = vadd.f32 %v2293_v3, %v2292_v56  ;;  %v351_v56 = vld [vmem:[#allocation2 + $0x40] sm:$0xff] }
 0x15d   : > { %v3322_v52 = vld [vmem:[#allocation2] sm:$0xff] }
 0x15e   : > { %1308 = vst.msk [vmem:[#allocation2 + $0x10] sm:$0xff] %vm241_vm0, %v1275_v49  ;;  %v1276_v54 = vadd.f32 %v1158_v50, %v346_v48  ;;  %v2383_v55 = vpop.f32.mrb[24].mxu1  ;;  %v1373_v57 = vmax.f32 %v3322_v52, 1.0  ;;  %v2295_v18 = vpop.f32.mrb[24].mxu0 }
 0x15f   : > { %v2384_v60 = vpop.f32.mrb[25].mxu1  ;;  %v3326_v61 = vld [vmem:[#allocation2 + $0x8] sm:$0xff]  ;;  %v2296_v22 = vpop.f32.mrb[25].mxu0 }
 0x160   : > { %1309 = vst.msk [vmem:[#allocation2 + $0x18] sm:$0xff] %vm241_vm0, %v1276_v54  ;;  %v2385_v1 = vadd.f32 %v2384_v60, %v2383_v55  ;;  %v2386_v62 = vpop.f32.mrb[26].mxu1  ;;  %2764 = vrcp.f32 %v1373_v57  ;;  %v1374_v2 = vmax.f32 %v3326_v61, 1.0  ;;  %v2298_v26 = vpop.f32.mrb[26].mxu0 }
 0x161   : > { %v2387_v7 = vpop.f32.mrb[27].mxu1  ;;  %v2299_v29 = vpop.f32.mrb[27].mxu0 }
 0x162   : > { %v1163_v9 = vadd.f32 %v2385_v1, %v3301_v4  ;;  %v2388_v12 = vadd.f32 %v2387_v7, %v2386_v62  ;;  %2766 = vrcp.f32 %v1374_v2  ;;  %v3342_v4 = vadd.f32 %v2296_v22, %v2295_v18  ;;  %v352_v7 = vld [vmem:[#allocation2 + $0x48] sm:$0xff] }
 0x163   : > { %v3346_v32 = vadd.f32 %v2299_v29, %v2298_v26  ;;  %v353_v29 = vld [vmem:[#allocation2 + $0x50] sm:$0xff] }
 0x164   : > { %v1277_v14 = vadd.f32 %v1163_v9, %v347_v5  ;;  %v1166_v15 = vadd.f32 %v2388_v12, %v3305_v10 }
 0x165   : > { %v3336_v17 = vld [vmem:[#allocation2 + $0x10] sm:$0xff] }
 0x166   : > { %1310 = vst.msk [vmem:[#allocation2 + $0x20] sm:$0xff] %vm241_vm0, %v1277_v14  ;;  %v1278_v19 = vadd.f32 %v1166_v15, %v348_v13  ;;  %v2389_v20 = vpop.f32.mrb[28].mxu1  ;;  %v1375_v21 = vmax.f32 %v3336_v17, 1.0  ;;  %v2301_v43 = vpop.f32.mrb[28].mxu0 }
 0x167   : > { %v2390_v23 = vpop.f32.mrb[29].mxu1  ;;  %v3340_v25 = vld [vmem:[#allocation2 + $0x18] sm:$0xff]  ;;  %v2302_v50 = vpop.f32.mrb[29].mxu0 }
 0x168   : > { %1311 = vst.msk [vmem:[#allocation2 + $0x28] sm:$0xff] %vm241_vm0, %v1278_v19  ;;  %v2391_v10 = vadd.f32 %v2390_v23, %v2389_v20  ;;  %v2392_v27 = vpop.f32.mrb[30].mxu1  ;;  %2768 = vrcp.f32 %v1375_v21  ;;  %v1376_v28 = vmax.f32 %v3340_v25, 1.0  ;;  %v3356_v54 = vadd.f32 %v2302_v50, %v2301_v43  ;;  %v2304_v55 = vpop.f32.mrb[30].mxu0 }
 0x169   : > { %v2393_v31 = vpop.f32.mrb[31].mxu1  ;;  %v2305_v60 = vpop.f32.mrb[31].mxu0 }
 0x16a   : > { %v2765_v33 = vpop.eup %2764  ;;  %v1171_v34 = vadd.f32 %v2391_v10, %v3309_v16  ;;  %v2394_v37 = vadd.f32 %v2393_v31, %v2392_v27  ;;  %2770 = vrcp.f32 %v1376_v28  ;;  %v3360_v62 = vadd.f32 %v2305_v60, %v2304_v55 }
 0x16b   : > { %1439 = vperm.xlu0 %2634, %v2765_v33  }
 0x16c   : > { %v1279_v40 = vadd.f32 %v1171_v34, %v349_v30  ;;  %v1174_v41 = vadd.f32 %v2394_v37, %v3314_v24  ;;  %v2767_v45 = vpop.eup %2766 }
 0x16d   : > { %v3350_v42 = vld [vmem:[#allocation2 + $0x20] sm:$0xff] }
 0x16e   : > { %1312 = vst.msk [vmem:[#allocation2 + $0x30] sm:$0xff] %vm241_vm0, %v1279_v40  ;;  %v1280_v47 = vadd.f32 %v1174_v41, %v350_v38  ;;  %v2395_v48 = vpop.f32.mrb[32].mxu1  ;;  %v1377_v49 = vmax.f32 %v3350_v42, 1.0  ;;  %v2307_v14 = vpop.f32.mrb[32].mxu0  ;;  %v354_v38 = vld [vmem:[#allocation2 + $0x58] sm:$0xff] }
 0x16f   : > { %v2396_v53 = vpop.f32.mrb[33].mxu1  ;;  %1444 = vperm.xlu0 %2634, %v2767_v45   ;;  %v3354_v16 = vld [vmem:[#allocation2 + $0x28] sm:$0xff]  ;;  %v2308_v21 = vpop.f32.mrb[33].mxu0 }
 0x170   : > { %1313 = vst.msk [vmem:[#allocation2 + $0x38] sm:$0xff] %vm241_vm0, %v1280_v47  ;;  %v2397_v24 = vadd.f32 %v2396_v53, %v2395_v48  ;;  %v2398_v57 = vpop.f32.mrb[34].mxu1  ;;  %2772 = vrcp.f32 %v1377_v49  ;;  %v1378_v59 = vmax.f32 %v3354_v16, 1.0  ;;  %v3370_v23 = vadd.f32 %v2308_v21, %v2307_v14  ;;  %v2310_v26 = vpop.f32.mrb[34].mxu0 }
 0x171   : > { %v2399_v1 = vpop.f32.mrb[35].mxu1  ;;  %v2311_v28 = vpop.f32.mrb[35].mxu0 }
 0x172   : > { %v2769_v2 = vpop.eup %2768  ;;  %v1179_v3 = vadd.f32 %v2397_v24, %v3317_v35  ;;  %v2400_v5 = vadd.f32 %v2399_v1, %v2398_v57  ;;  %2774 = vrcp.f32 %v1378_v59  ;;  %v3374_v31 = vadd.f32 %v2311_v28, %v2310_v26  ;;  %v355_v1 = vld [vmem:[#allocation2 + $0x60] sm:$0xff] }
 0x173   : > { %1449 = vperm.xlu1 %2635, %v2769_v2  }
 0x174   : > { %v1281_v9 = vadd.f32 %v1179_v3, %v351_v56  ;;  %v1182_v12 = vadd.f32 %v2400_v5, %v3320_v44  ;;  %v2771_v15 = vpop.eup %2770 }
 0x175   : > { %v3364_v13 = vld [vmem:[#allocation2 + $0x30] sm:$0xff] }
 0x176   : > { %1314 = vst.msk [vmem:[#allocation2 + $0x40] sm:$0xff] %vm241_vm0, %v1281_v9  ;;  %v1282_v18 = vadd.f32 %v1182_v12, %v352_v7  ;;  %v2401_v19 = vpop.f32.mrb[36].mxu1  ;;  %v1379_v20 = vmax.f32 %v3364_v13, 1.0  ;;  %v2313_v47 = vpop.f32.mrb[36].mxu0  ;;  %v356_v12 = vld [vmem:[#allocation2 + $0x68] sm:$0xff] }
 0x177   : > { %v2402_v22 = vpop.f32.mrb[37].mxu1  ;;  %1454 = vperm.xlu1 %2635, %v2771_v15   ;;  %v3368_v35 = vld [vmem:[#allocation2 + $0x38] sm:$0xff]  ;;  %v2314_v53 = vpop.f32.mrb[37].mxu0 }
 0x178   : > { %1315 = vst.msk [vmem:[#allocation2 + $0x48] sm:$0xff] %vm241_vm0, %v1282_v18  ;;  %v2403_v44 = vadd.f32 %v2402_v22, %v2401_v19  ;;  %v2404_v10 = vpop.f32.mrb[38].mxu1  ;;  %2776 = vrcp.f32 %v1379_v20  ;;  %v1380_v27 = vmax.f32 %v3368_v35, 1.0  ;;  %v3384_v24 = vadd.f32 %v2314_v53, %v2313_v47  ;;  %v2316_v57 = vpop.f32.mrb[38].mxu0  ;;  %v358_v47 = vld [vmem:[#allocation2 + $0x78] sm:$0xff] }
 0x179   : > { %v2405_v30 = vpop.f32.mrb[39].mxu1  ;;  %v2317_v56 = vpop.f32.mrb[39].mxu0 }
 0x17a   : > { %v2773_v33 = vpop.eup %2772  ;;  %v1187_v34 = vadd.f32 %v2403_v44, %v3328_v0  ;;  %v2406_v37 = vadd.f32 %v2405_v30, %v2404_v10  ;;  %2778 = vrcp.f32 %v1380_v27  ;;  %v3388_v3 = vadd.f32 %v2317_v56, %v2316_v57 }
 0x17b   : > { %1459 = vperm.xlu0 %2634, %v2773_v33  }
 0x17c   : > { %v2775_v40 = vpop.eup %2774  ;;  %v1283_v41 = vadd.f32 %v1187_v34, %v353_v29  ;;  %v1190_v43 = vadd.f32 %v2406_v37, %v3332_v8  ;;  %v357_v34 = vld [vmem:[#allocation2 + $0x70] sm:$0xff] }
 0x17d   : > { %1464 = vperm.xlu1 %2635, %v2775_v40   ;;  %v3378_v45 = vld [vmem:[#allocation2 + $0x40] sm:$0xff] }
 0x17e   : > { %1316 = vst.msk [vmem:[#allocation2 + $0x50] sm:$0xff] %vm241_vm0, %v1283_v41  ;;  %v1284_v48 = vadd.f32 %v1190_v43, %v354_v38  ;;  %v2407_v49 = vpop.f32.mrb[40].mxu1  ;;  %v1381_v50 = vmax.f32 %v3378_v45, 1.0  ;;  %v2319_v20 = vpop.f32.mrb[40].mxu0 }
 0x17f   : > { %v2408_v0 = vpop.f32.mrb[41].mxu1  ;;  %v3382_v55 = vld [vmem:[#allocation2 + $0x48] sm:$0xff]  ;;  %v2320_v44 = vpop.f32.mrb[41].mxu0 }
 0x180   : > { %1317 = vst.msk [vmem:[#allocation2 + $0x58] sm:$0xff] %vm241_vm0, %v1284_v48  ;;  %v2409_v8 = vadd.f32 %v2408_v0, %v2407_v49  ;;  %v2410_v59 = vpop.f32.mrb[42].mxu1  ;;  %2780 = vrcp.f32 %v1381_v50  ;;  %v1382_v60 = vmax.f32 %v3382_v55, 1.0  ;;  %v3398_v27 = vadd.f32 %v2320_v44, %v2319_v20  ;;  %v2322_v28 = vpop.f32.mrb[42].mxu0 }
 0x181   : > { %v2411_v2 = vpop.f32.mrb[43].mxu1  ;;  %v2323_v33 = vpop.f32.mrb[43].mxu0 }
 0x182   : > { %v2777_v5 = vpop.eup %2776  ;;  %v1195_v7 = vadd.f32 %v2409_v8, %v3342_v4  ;;  %v2412_v9 = vadd.f32 %v2411_v2, %v2410_v59  ;;  %2782 = vrcp.f32 %v1382_v60  ;;  %v3402_v38 = vadd.f32 %v2323_v33, %v2322_v28 }
 0x183   : > { %1469 = vperm.xlu0 %2634, %v2777_v5  }
 0x184   : > { %v2779_v14 = vpop.eup %2778  ;;  %v1285_v15 = vadd.f32 %v1195_v7, %v355_v1  ;;  %v1198_v18 = vadd.f32 %v2412_v9, %v3346_v32 }
 0x185   : > { %1474 = vperm.xlu1 %2635, %v2779_v14   ;;  %v3392_v19 = vld [vmem:[#allocation2 + $0x50] sm:$0xff] }
 0x186   : > { %1318 = vst.msk [vmem:[#allocation2 + $0x60] sm:$0xff] %vm241_vm0, %v1285_v15  ;;  %v1286_v21 = vadd.f32 %v1198_v18, %v356_v12  ;;  %v2413_v22 = vpop.f32.mrb[44].mxu1  ;;  %v1383_v26 = vmax.f32 %v3392_v19, 1.0  ;;  %v2325_v0 = vpop.f32.mrb[44].mxu0  ;;  %v359_v12 = vld [vmem:[#allocation2 + $0x80] sm:$0xff] }
 0x187   : > { %v2414_v4 = vpop.f32.mrb[45].mxu1  ;;  %v3396_v10 = vld [vmem:[#allocation2 + $0x58] sm:$0xff]  ;;  %v2326_v60 = vpop.f32.mrb[45].mxu0 }
 0x188   : > { %1319 = vst.msk [vmem:[#allocation2 + $0x68] sm:$0xff] %vm241_vm0, %v1286_v21  ;;  %v2415_v32 = vadd.f32 %v2414_v4, %v2413_v22  ;;  %v2416_v29 = vpop.f32.mrb[46].mxu1  ;;  %2784 = vrcp.f32 %v1383_v26  ;;  %v1384_v30 = vmax.f32 %v3396_v10, 1.0  ;;  %v3412_v1 = vadd.f32 %v2326_v60, %v2325_v0  ;;  %v2328_v2 = vpop.f32.mrb[46].mxu0  ;;  %v360_v22 = vld [vmem:[#allocation2 + $0x88] sm:$0xff] }
 0x189   : > { %v2417_v37 = vpop.f32.mrb[47].mxu1  ;;  %v2329_v9 = vpop.f32.mrb[47].mxu0 }
 0x18a   : > { %v2781_v40 = vpop.eup %2780  ;;  %v1203_v41 = vadd.f32 %v2415_v32, %v3356_v54  ;;  %v2418_v43 = vadd.f32 %v2417_v37, %v2416_v29  ;;  %2786 = vrcp.f32 %v1384_v30  ;;  %v3416_v15 = vadd.f32 %v2329_v9, %v2328_v2 }
 0x18b   : > { %1479 = vperm.xlu0 %2634, %v2781_v40  }
 0x18c   : > { %v2783_v48 = vpop.eup %2782  ;;  %v1287_v49 = vadd.f32 %v1203_v41, %v357_v34  ;;  %v1206_v50 = vadd.f32 %v2418_v43, %v3360_v62 }
 0x18d   : > { %1484 = vperm.xlu1 %2635, %v2783_v48   ;;  %v3406_v53 = vld [vmem:[#allocation2 + $0x60] sm:$0xff] }
 0x18e   : > { %1320 = vst.msk [vmem:[#allocation2 + $0x70] sm:$0xff] %vm241_vm0, %v1287_v49  ;;  %v1288_v57 = vadd.f32 %v1206_v50, %v358_v47  ;;  %v2419_v8 = vpop.f32.mrb[48].mxu1  ;;  %v1385_v59 = vmax.f32 %v3406_v53, 1.0  ;;  %v362_v49 = vld [vmem:[#allocation2 + $0x98] sm:$0xff] }
 0x18f   : > { %v2420_v54 = vpop.f32.mrb[49].mxu1  ;;  %v3410_v56 = vld [vmem:[#allocation2 + $0x68] sm:$0xff] }
 0x190   : > { %1321 = vst.msk [vmem:[#allocation2 + $0x78] sm:$0xff] %vm241_vm0, %v1288_v57  ;;  %v2421_v62 = vadd.f32 %v2420_v54, %v2419_v8  ;;  %v2422_v5 = vpop.f32.mrb[50].mxu1  ;;  %2788 = vrcp.f32 %v1385_v59  ;;  %v1386_v7 = vmax.f32 %v3410_v56, 1.0 }
 0x191   : > { %v2423_v14 = vpop.f32.mrb[51].mxu1 }
 0x192   : > { %v2785_v18 = vpop.eup %2784  ;;  %v1211_v20 = vadd.f32 %v2421_v62, %v3370_v23  ;;  %v2424_v21 = vadd.f32 %v2423_v14, %v2422_v5  ;;  %2790 = vrcp.f32 %v1386_v7 }
 0x193   : > { %1489 = vperm.xlu0 %2634, %v2785_v18  }
 0x194   : > { %v2787_v26 = vpop.eup %2786  ;;  %v1289_v44 = vadd.f32 %v1211_v20, %v359_v12  ;;  %v1214_v4 = vadd.f32 %v2424_v21, %v3374_v31  ;;  %v361_v31 = vld [vmem:[#allocation2 + $0x90] sm:$0xff]  ;;  %v364_v20 = vld [vmem:[#allocation2 + $0xa8] sm:$0xff] }
 0x195   : > { %1494 = vperm.xlu1 %2635, %v2787_v26   ;;  %v3420_v28 = vld [vmem:[#allocation2 + $0x70] sm:$0xff] }
 0x196   : > { %1322 = vst.msk [vmem:[#allocation2 + $0x80] sm:$0xff] %vm241_vm0, %v1289_v44  ;;  %v1290_v32 = vadd.f32 %v1214_v4, %v360_v22  ;;  %v2425_v29 = vpop.f32.mrb[52].mxu1  ;;  %v1387_v30 = vmax.f32 %v3420_v28, 1.0 }
 0x197   : > { %v2426_v33 = vpop.f32.mrb[53].mxu1  ;;  %v3424_v34 = vld [vmem:[#allocation2 + $0x78] sm:$0xff] }
 0x198   : > { %1323 = vst.msk [vmem:[#allocation2 + $0x88] sm:$0xff] %vm241_vm0, %v1290_v32  ;;  %v2427_v23 = vadd.f32 %v2426_v33, %v2425_v29  ;;  %v2428_v37 = vpop.f32.mrb[54].mxu1  ;;  %2792 = vrcp.f32 %v1387_v30  ;;  %v1388_v40 = vmax.f32 %v3424_v34, 1.0 }
 0x199   : > { %v2429_v41 = vpop.f32.mrb[55].mxu1 }
 0x19a   : > { %v2789_v43 = vpop.eup %2788  ;;  %v1219_v47 = vadd.f32 %v2427_v23, %v3384_v24  ;;  %v2430_v48 = vadd.f32 %v2429_v41, %v2428_v37  ;;  %2794 = vrcp.f32 %v1388_v40 }
 0x19b   : > { %1499 = vperm.xlu0 %2634, %v2789_v43  }
 0x19c   : > { %v2791_v50 = vpop.eup %2790  ;;  %v1291_v0 = vadd.f32 %v1219_v47, %v361_v31  ;;  %v1222_v57 = vadd.f32 %v2430_v48, %v3388_v3  ;;  %v363_v3 = vld [vmem:[#allocation2 + $0xa0] sm:$0xff]  ;;  %v366_v47 = vld [vmem:[#allocation2 + $0xb8] sm:$0xff] }
 0x19d   : > { %1504 = vperm.xlu1 %2635, %v2791_v50   ;;  %v3430_v8 = vld [vmem:[#allocation2 + $0x80] sm:$0xff] }
 0x19e   : > { %1324 = vst.msk [vmem:[#allocation2 + $0x90] sm:$0xff] %vm241_vm0, %v1291_v0  ;;  %v1292_v59 = vadd.f32 %v1222_v57, %v362_v49  ;;  %v2431_v60 = vpop.f32.mrb[56].mxu1  ;;  %v1389_v54 = vmax.f32 %v3430_v8, 1.0 }
 0x19f   : > { %v2432_v2 = vpop.f32.mrb[57].mxu1  ;;  %v3434_v62 = vld [vmem:[#allocation2 + $0x88] sm:$0xff] }
 0x1a0   : > { %1325 = vst.msk [vmem:[#allocation2 + $0x98] sm:$0xff] %vm241_vm0, %v1292_v59  ;;  %v2433_v24 = vadd.f32 %v2432_v2, %v2431_v60  ;;  %v2434_v5 = vpop.f32.mrb[58].mxu1  ;;  %2796 = vrcp.f32 %v1389_v54  ;;  %v1390_v7 = vmax.f32 %v3434_v62, 1.0 }
 0x1a1   : > { %v2435_v9 = vpop.f32.mrb[59].mxu1 }
 0x1a2   : > { %v2793_v12 = vpop.eup %2792  ;;  %v1227_v14 = vadd.f32 %v2433_v24, %v3398_v27  ;;  %v2436_v18 = vadd.f32 %v2435_v9, %v2434_v5  ;;  %2798 = vrcp.f32 %v1390_v7 }
 0x1a3   : > { %1509 = vperm.xlu0 %2634, %v2793_v12  }
 0x1a4   : > { %v2795_v21 = vpop.eup %2794  ;;  %v1293_v22 = vadd.f32 %v1227_v14, %v363_v3  ;;  %v1230_v26 = vadd.f32 %v2436_v18, %v3402_v38  ;;  %v365_v38 = vld [vmem:[#allocation2 + $0xb0] sm:$0xff]  ;;  %v368_v14 = vld [vmem:[#allocation2 + $0xc8] sm:$0xff] }
 0x1a5   : > { %1514 = vperm.xlu1 %2635, %v2795_v21   ;;  %v3440_v44 = vld [vmem:[#allocation2 + $0x90] sm:$0xff] }
 0x1a6   : > { %1326 = vst.msk [vmem:[#allocation2 + $0xa0] sm:$0xff] %vm241_vm0, %v1293_v22  ;;  %v1294_v4 = vadd.f32 %v1230_v26, %v364_v20  ;;  %v2437_v32 = vpop.f32.mrb[60].mxu1  ;;  %v1391_v29 = vmax.f32 %v3440_v44, 1.0 }
 0x1a7   : > { %v2438_v30 = vpop.f32.mrb[61].mxu1  ;;  %v3444_v33 = vld [vmem:[#allocation2 + $0x98] sm:$0xff] }
 0x1a8   : > { %1327 = vst.msk [vmem:[#allocation2 + $0xa8] sm:$0xff] %vm241_vm0, %v1294_v4  ;;  %v2439_v27 = vadd.f32 %v2438_v30, %v2437_v32  ;;  %v2440_v23 = vpop.f32.mrb[62].mxu1  ;;  %2800 = vrcp.f32 %v1391_v29  ;;  %v1392_v37 = vmax.f32 %v3444_v33, 1.0 }
 0x1a9   : > { %v2441_v40 = vpop.f32.mrb[63].mxu1 }
 0x1aa   : > { %v2797_v31 = vpop.eup %2796  ;;  %v1235_v41 = vadd.f32 %v2439_v27, %v3412_v1  ;;  %v2442_v43 = vadd.f32 %v2441_v40, %v2440_v23  ;;  %2802 = vrcp.f32 %v1392_v37 }
 0x1ab   : > { %1519 = vperm.xlu0 %2634, %v2797_v31  }
 0x1ac   : > { %v2799_v48 = vpop.eup %2798  ;;  %v1295_v49 = vadd.f32 %v1235_v41, %v365_v38  ;;  %v1238_v50 = vadd.f32 %v2442_v43, %v3416_v15  ;;  %v367_v15 = vld [vmem:[#allocation2 + $0xc0] sm:$0xff]  ;;  %v370_v41 = vld [vmem:[#allocation2 + $0xd8] sm:$0xff] }
 0x1ad   : > { %1524 = vperm.xlu1 %2635, %v2799_v48   ;;  %v3450_v0 = vld [vmem:[#allocation2 + $0xa0] sm:$0xff] }
 0x1ae   : > { %1328 = vst.msk [vmem:[#allocation2 + $0xb0] sm:$0xff] %vm241_vm0, %v1295_v49  ;;  %v1296_v57 = vadd.f32 %v1238_v50, %v366_v47  ;;  %v2443_v59 = vpop.f32.mrb[64].mxu1  ;;  %v1393_v60 = vmax.f32 %v3450_v0, 1.0 }
 0x1af   : > { %v2444_v54 = vpop.f32.mrb[65].mxu1  ;;  %v3454_v2 = vld [vmem:[#allocation2 + $0xa8] sm:$0xff] }
 0x1b0   : > { %1329 = vst.msk [vmem:[#allocation2 + $0xb8] sm:$0xff] %vm241_vm0, %v1296_v57  ;;  %v2445_v1 = vadd.f32 %v2444_v54, %v2443_v59  ;;  %v2446_v24 = vpop.f32.mrb[66].mxu1  ;;  %2804 = vrcp.f32 %v1393_v60  ;;  %v1394_v5 = vmax.f32 %v3454_v2, 1.0 }
 0x1b1   : > { %v2447_v7 = vpop.f32.mrb[67].mxu1 }
 0x1b2   : > { %v2801_v3 = vpop.eup %2800  ;;  %v1243_v9 = vadd.f32 %v2445_v1, %v3289_v36  ;;  %v2448_v12 = vadd.f32 %v2447_v7, %v2446_v24  ;;  %2806 = vrcp.f32 %v1394_v5 }
 0x1b3   : > { %1529 = vperm.xlu0 %2634, %v2801_v3  }
 0x1b4   : > { %v2803_v18 = vpop.eup %2802  ;;  %v1297_v20 = vadd.f32 %v1243_v9, %v367_v15  ;;  %v1246_v21 = vadd.f32 %v2448_v12, %v3291_v39  ;;  %v369_v39 = vld [vmem:[#allocation2 + $0xd0] sm:$0xff]  ;;  %v372_v9 = vld [vmem:[#allocation2 + $0xe8] sm:$0xff] }
 0x1b5   : > { %1534 = vperm.xlu1 %2635, %v2803_v18   ;;  %v3460_v22 = vld [vmem:[#allocation2 + $0xb0] sm:$0xff] }
 0x1b6   : > { %1330 = vst.msk [vmem:[#allocation2 + $0xc0] sm:$0xff] %vm241_vm0, %v1297_v20  ;;  %v1298_v26 = vadd.f32 %v1246_v21, %v368_v14  ;;  %v2449_v4 = vpop.f32.mrb[68].mxu1  ;;  %v1395_v32 = vmax.f32 %v3460_v22, 1.0 }
 0x1b7   : > { %v2450_v29 = vpop.f32.mrb[69].mxu1  ;;  %v3464_v30 = vld [vmem:[#allocation2 + $0xb8] sm:$0xff] }
 0x1b8   : > { %1331 = vst.msk [vmem:[#allocation2 + $0xc8] sm:$0xff] %vm241_vm0, %v1298_v26  ;;  %v2451_v36 = vadd.f32 %v2450_v29, %v2449_v4  ;;  %v2452_v27 = vpop.f32.mrb[70].mxu1  ;;  %2808 = vrcp.f32 %v1395_v32  ;;  %v1396_v23 = vmax.f32 %v3464_v30, 1.0 }
 0x1b9   : > { %v2453_v37 = vpop.f32.mrb[71].mxu1 }
 0x1ba   : > { %v2805_v38 = vpop.eup %2804  ;;  %v1251_v40 = vadd.f32 %v2451_v36, %v3293_v46  ;;  %v2454_v31 = vadd.f32 %v2453_v37, %v2452_v27  ;;  %2810 = vrcp.f32 %v1396_v23 }
 0x1bb   : > { %1539 = vperm.xlu0 %2634, %v2805_v38  }
 0x1bc   : > { %v2807_v43 = vpop.eup %2806  ;;  %v1299_v47 = vadd.f32 %v1251_v40, %v369_v39  ;;  %v1254_v48 = vadd.f32 %v2454_v31, %v3295_v51  ;;  %v371_v51 = vld [vmem:[#allocation2 + $0xe0] sm:$0xff]  ;;  %v374_v40 = vld [vmem:[#allocation2 + $0xf8] sm:$0xff] }
 0x1bd   : > { %1544 = vperm.xlu1 %2635, %v2807_v43   ;;  %v3470_v49 = vld [vmem:[#allocation2 + $0xc0] sm:$0xff] }
 0x1be   : > { %1332 = vst.msk [vmem:[#allocation2 + $0xd0] sm:$0xff] %vm241_vm0, %v1299_v47  ;;  %v1300_v50 = vadd.f32 %v1254_v48, %v370_v41  ;;  %v2455_v57 = vpop.f32.mrb[72].mxu1  ;;  %v1397_v59 = vmax.f32 %v3470_v49, 1.0 }
 0x1bf   : > { %v2456_v60 = vpop.f32.mrb[73].mxu1  ;;  %v3474_v54 = vld [vmem:[#allocation2 + $0xc8] sm:$0xff] }
 0x1c0   : > { %1333 = vst.msk [vmem:[#allocation2 + $0xd8] sm:$0xff] %vm241_vm0, %v1300_v50  ;;  %v2457_v46 = vadd.f32 %v2456_v60, %v2455_v57  ;;  %v2458_v1 = vpop.f32.mrb[74].mxu1  ;;  %2812 = vrcp.f32 %v1397_v59  ;;  %v1398_v24 = vmax.f32 %v3474_v54, 1.0 }
 0x1c1   : > { %v2459_v5 = vpop.f32.mrb[75].mxu1 }
 0x1c2   : > { %v2809_v15 = vpop.eup %2808  ;;  %v1259_v7 = vadd.f32 %v2457_v46, %v3297_v58  ;;  %v2460_v3 = vadd.f32 %v2459_v5, %v2458_v1  ;;  %2814 = vrcp.f32 %v1398_v24 }
 0x1c3   : > { %1549 = vperm.xlu0 %2634, %v2809_v15  }
 0x1c4   : > { %v2811_v12 = vpop.eup %2810  ;;  %v1301_v14 = vadd.f32 %v1259_v7, %v371_v51  ;;  %v1262_v18 = vadd.f32 %v2460_v3, %v3299_v63  ;;  %v373_v63 = vld [vmem:[#allocation2 + $0xf0] sm:$0xff] }
 0x1c5   : > { %1554 = vperm.xlu1 %2635, %v2811_v12   ;;  %v3480_v20 = vld [vmem:[#allocation2 + $0xd0] sm:$0xff] }
 0x1c6   : > { %1334 = vst.msk [vmem:[#allocation2 + $0xe0] sm:$0xff] %vm241_vm0, %v1301_v14  ;;  %v1302_v21 = vadd.f32 %v1262_v18, %v372_v9  ;;  %v2461_v26 = vpop.f32.mrb[76].mxu1  ;;  %v1399_v4 = vmax.f32 %v3480_v20, 1.0 }
 0x1c7   : > { %v2462_v32 = vpop.f32.mrb[77].mxu1  ;;  %v3484_v29 = vld [vmem:[#allocation2 + $0xd8] sm:$0xff] }
 0x1c8   : > { %1335 = vst.msk [vmem:[#allocation2 + $0xe8] sm:$0xff] %vm241_vm0, %v1302_v21  ;;  %v2463_v58 = vadd.f32 %v2462_v32, %v2461_v26  ;;  %v2464_v36 = vpop.f32.mrb[78].mxu1  ;;  %2816 = vrcp.f32 %v1399_v4  ;;  %v1400_v27 = vmax.f32 %v3484_v29, 1.0 }
 0x1c9   : > { %v2465_v23 = vpop.f32.mrb[79].mxu1 }
 0x1ca   : > { %v2813_v39 = vpop.eup %2812  ;;  %v1267_v37 = vadd.f32 %v2463_v58, %v3303_v6  ;;  %v2466_v38 = vadd.f32 %v2465_v23, %v2464_v36  ;;  %2818 = vrcp.f32 %v1400_v27 }
 0x1cb   : > { %1559 = vperm.xlu0 %2634, %v2813_v39  }
 0x1cc   : > { %v2815_v31 = vpop.eup %2814  ;;  %v1303_v41 = vadd.f32 %v1267_v37, %v373_v63  ;;  %v1270_v43 = vadd.f32 %v2466_v38, %v3307_v11 }
 0x1cd   : > { %1564 = vperm.xlu1 %2635, %v2815_v31   ;;  %v3490_v47 = vld [vmem:[#allocation2 + $0xe0] sm:$0xff] }
 0x1ce   : > { %1336 = vst.msk [vmem:[#allocation2 + $0xf0] sm:$0xff] %vm241_vm0, %v1303_v41  ;;  %v1304_v48 = vadd.f32 %v1270_v43, %v374_v40  ;;  %v1401_v50 = vmax.f32 %v3490_v47, 1.0 }
 0x1cf   : > { %v3494_v57 = vld [vmem:[#allocation2 + $0xe8] sm:$0xff] }
 0x1d0   : > { %1337 = vst.msk [vmem:[#allocation2 + $0xf8] sm:$0xff] %vm241_vm0, %v1304_v48  ;;  %2820 = vrcp.f32 %v1401_v50  ;;  %v1402_v6 = vmax.f32 %v3494_v57, 1.0 }
 0x1d2   : > { %v2817_v59 = vpop.eup %2816  ;;  %2822 = vrcp.f32 %v1402_v6 }
 0x1d3   : > { %1569 = vperm.xlu0 %2634, %v2817_v59  }
 0x1d4   : > { %v2819_v60 = vpop.eup %2818 }
 0x1d5   : > { %1574 = vperm.xlu1 %2635, %v2819_v60   ;;  %v3498_v11 = vld [vmem:[#allocation2 + $0xf0] sm:$0xff] }
 0x1d6   : > { %v1403_v46 = vmax.f32 %v3498_v11, 1.0 }
 0x1d7   : > { %v3501_v1 = vld [vmem:[#allocation2 + $0xf8] sm:$0xff] }
 0x1d8   : > { %2824 = vrcp.f32 %v1403_v46  ;;  %v1404_v24 = vmax.f32 %v3501_v1, 1.0 }
 0x1da   : > { %v2821_v51 = vpop.eup %2820  ;;  %2826 = vrcp.f32 %v1404_v24 }
 0x1db   : > { %1579 = vperm.xlu0 %2634, %v2821_v51  }
 0x1dc   : > { %v2823_v5 = vpop.eup %2822 }
 0x1dd   : > { %1584 = vperm.xlu1 %2635, %v2823_v5  }
 0x1e2   : > { %v2825_v15 = vpop.eup %2824 }
 0x1e3   : > { %1589 = vperm.xlu0 %2634, %v2825_v15  }
 0x1e4   : > { %v2827_v7 = vpop.eup %2826 }
 0x1e5   : > { %1594 = vperm.xlu1 %2635, %v2827_v7  }
 0x1ea   : > { %v1440_v3 = vpop.permute.xlu0 %1439 }
 0x1eb   : > { %v1597_v9 = vmul.f32 %v1440_v3, %v3322_v52 }
 0x1ed   : > { %2502 = vmatprep.mubr.msk.f32.mxu0 %vm241_vm0, %v1597_v9 }
 0x1ee   : > { %v1445_v12 = vpop.permute.xlu0 %1444 }
 0x1ef   : > { %v1598_v14 = vmul.f32 %v1445_v12, %v3326_v61 }
 0x1f1   : > { %2503 = vmatmul.mubr.msk.f32.vlgmr.msra.gmra.mrb[48].mxu0 %vm241_vm0, %v1598_v14 }
 0x1f2   : > { %v1450_v18 = vpop.permute.xlu1 %1449 }
 0x1f3   : > { %v1599_v21 = vmul.f32 %v1450_v18, %v3336_v17 }
 0x1f5   : > { %2505 = vmatprep.mubr.msk.f32.mxu0 %vm241_vm0, %v1599_v21 }
 0x1f6   : > { %v1455_v26 = vpop.permute.xlu1 %1454 }
 0x1f7   : > { %v1600_v4 = vmul.f32 %v1455_v26, %v3340_v25 }
 0x1f9   : > { %2506 = vmatmul.mubr.msk.f32.gmra.mrb[50].mxu0 %vm241_vm0, %v1600_v4 }
 0x1fa   : > { %v1460_v32 = vpop.permute.xlu0 %1459 }
 0x1fb   : > { %v1601_v52 = vmul.f32 %v1460_v32, %v3350_v42 }
 0x1fc   : > { %v1465_v58 = vpop.permute.xlu1 %1464 }
 0x1fd   : > { %v1602_v36 = vmul.f32 %v1465_v58, %v3354_v16  ;;  %2508 = vmatprep.mubr.msk.f32.mxu0 %vm241_vm0, %v1601_v52 }
 0x1ff   : > { %2509 = vmatmul.mubr.msk.f32.gmra.mrb[52].mxu0 %vm241_vm0, %v1602_v36 }
 0x202   : > { %v1470_v61 = vpop.permute.xlu0 %1469 }
 0x203   : > { %v1603_v17 = vmul.f32 %v1470_v61, %v3364_v13 }
 0x204   : > { %v1475_v27 = vpop.permute.xlu1 %1474 }
 0x205   : > { %v1604_v63 = vmul.f32 %v1475_v27, %v3368_v35  ;;  %2511 = vmatprep.mubr.msk.f32.mxu0 %vm241_vm0, %v1603_v17 }
 0x207   : > { %2512 = vmatmul.mubr.msk.f32.gmra.mrb[54].mxu0 %vm241_vm0, %v1604_v63 }
 0x20a   : > { %v1480_v25 = vpop.permute.xlu0 %1479 }
 0x20b   : > { %v1605_v42 = vmul.f32 %v1480_v25, %v3378_v45 }
 0x20c   : > { %v1485_v23 = vpop.permute.xlu1 %1484 }
 0x20d   : > { %v1606_v16 = vmul.f32 %v1485_v23, %v3382_v55  ;;  %2514 = vmatprep.mubr.msk.f32.mxu0 %vm241_vm0, %v1605_v42 }
 0x20f   : > { %2515 = vmatmul.mubr.msk.f32.gmra.mrb[56].mxu0 %vm241_vm0, %v1606_v16 }
 0x212   : > { %v1490_v39 = vpop.permute.xlu0 %1489 }
 0x213   : > { %v1607_v13 = vmul.f32 %v1490_v39, %v3392_v19 }
 0x214   : > { %v1495_v37 = vpop.permute.xlu1 %1494 }
 0x215   : > { %v1608_v35 = vmul.f32 %v1495_v37, %v3396_v10  ;;  %2517 = vmatprep.mubr.msk.f32.mxu0 %vm241_vm0, %v1607_v13 }
 0x217   : > { %2518 = vmatmul.mubr.msk.f32.gmra.mrb[58].mxu0 %vm241_vm0, %v1608_v35 }
 0x21a   : > { %v1500_v38 = vpop.permute.xlu0 %1499 }
 0x21b   : > { %v1609_v45 = vmul.f32 %v1500_v38, %v3406_v53 }
 0x21c   : > { %v1505_v40 = vpop.permute.xlu1 %1504 }
 0x21d   : > { %v1610_v55 = vmul.f32 %v1505_v40, %v3410_v56  ;;  %2520 = vmatprep.mubr.msk.f32.mxu0 %vm241_vm0, %v1609_v45 }
 0x21f   : > { %2521 = vmatmul.mubr.msk.f32.gmra.mrb[60].mxu0 %vm241_vm0, %v1610_v55 }
 0x222   : > { %v1510_v31 = vpop.permute.xlu0 %1509 }
 0x223   : > { %v1611_v19 = vmul.f32 %v1510_v31, %v3420_v28 }
 0x224   : > { %v1515_v41 = vpop.permute.xlu1 %1514 }
 0x225   : > { %v1612_v10 = vmul.f32 %v1515_v41, %v3424_v34  ;;  %2523 = vmatprep.mubr.msk.f32.mxu0 %vm241_vm0, %v1611_v19 }
 0x227   : > { %2524 = vmatmul.mubr.msk.f32.gmra.mrb[62].mxu0 %vm241_vm0, %v1612_v10 }
 0x22a   : > { %v1520_v43 = vpop.permute.xlu0 %1519 }
 0x22b   : > { %v1613_v53 = vmul.f32 %v1520_v43, %v3430_v8 }
 0x22c   : > { %v1525_v48 = vpop.permute.xlu1 %1524 }
 0x22d   : > { %v1614_v56 = vmul.f32 %v1525_v48, %v3434_v62  ;;  %2526 = vmatprep.mubr.msk.f32.mxu0 %vm241_vm0, %v1613_v53 }
 0x22f   : > { %2527 = vmatmul.mubr.msk.f32.gmra.mrb[64].mxu0 %vm241_vm0, %v1614_v56 }
 0x232   : > { %v1530_v50 = vpop.permute.xlu0 %1529 }
 0x233   : > { %v1615_v28 = vmul.f32 %v1530_v50, %v3440_v44 }
 0x234   : > { %v1535_v6 = vpop.permute.xlu1 %1534 }
 0x235   : > { %v1616_v34 = vmul.f32 %v1535_v6, %v3444_v33  ;;  %2529 = vmatprep.mubr.msk.f32.mxu0 %vm241_vm0, %v1615_v28 }
 0x237   : > { %2530 = vmatmul.mubr.msk.f32.gmra.mrb[66].mxu0 %vm241_vm0, %v1616_v34 }
 0x23a   : > { %v1540_v59 = vpop.permute.xlu0 %1539 }
 0x23b   : > { %v1617_v8 = vmul.f32 %v1540_v59, %v3450_v0 }
 0x23c   : > { %v1545_v60 = vpop.permute.xlu1 %1544 }
 0x23d   : > { %v1618_v62 = vmul.f32 %v1545_v60, %v3454_v2  ;;  %2532 = vmatprep.mubr.msk.f32.mxu0 %vm241_vm0, %v1617_v8 }
 0x23f   : > { %2533 = vmatmul.mubr.msk.f32.gmra.mrb[68].mxu0 %vm241_vm0, %v1618_v62 }
 0x242   : > { %v1550_v46 = vpop.permute.xlu0 %1549 }
 0x243   : > { %v1619_v44 = vmul.f32 %v1550_v46, %v3460_v22 }
 0x244   : > { %v1555_v24 = vpop.permute.xlu1 %1554 }
 0x245   : > { %v1620_v33 = vmul.f32 %v1555_v24, %v3464_v30  ;;  %2535 = vmatprep.mubr.msk.f32.mxu0 %vm241_vm0, %v1619_v44 }
 0x247   : > { %2536 = vmatmul.mubr.msk.f32.gmra.mrb[70].mxu0 %vm241_vm0, %v1620_v33 }
 0x24a   : > { %v1560_v51 = vpop.permute.xlu0 %1559 }
 0x24b   : > { %v1621_v0 = vmul.f32 %v1560_v51, %v3470_v49 }
 0x24c   : > { %v1565_v5 = vpop.permute.xlu1 %1564 }
 0x24d   : > { %v1622_v2 = vmul.f32 %v1565_v5, %v3474_v54  ;;  %2538 = vmatprep.mubr.msk.f32.mxu0 %vm241_vm0, %v1621_v0 }
 0x24f   : > { %2539 = vmatmul.mubr.msk.f32.gmra.mrb[72].mxu0 %vm241_vm0, %v1622_v2 }
 0x252   : > { %v1570_v15 = vpop.permute.xlu0 %1569 }
 0x253   : > { %v1623_v22 = vmul.f32 %v1570_v15, %v3480_v20 }
 0x254   : > { %v1575_v7 = vpop.permute.xlu1 %1574 }
 0x255   : > { %v1624_v30 = vmul.f32 %v1575_v7, %v3484_v29  ;;  %2541 = vmatprep.mubr.msk.f32.mxu0 %vm241_vm0, %v1623_v22 }
 0x257   : > { %2542 = vmatmul.mubr.msk.f32.gmra.mrb[74].mxu0 %vm241_vm0, %v1624_v30 }
 0x25a   : > { %v1580_v3 = vpop.permute.xlu0 %1579 }
 0x25b   : > { %v1625_v49 = vmul.f32 %v1580_v3, %v3490_v47  ;;  %v3572_v47 = vld [vmem:[%s3699_s3] ss:$0 sm:$0xff] }
 0x25c   : > { %v1585_v9 = vpop.permute.xlu1 %1584 }
 0x25d   : > { %v1626_v54 = vmul.f32 %v1585_v9, %v3494_v57  ;;  %2544 = vmatprep.mubr.msk.f32.mxu0 %vm241_vm0, %v1625_v49 }
 0x25f   : > { %2545 = vmatmul.mubr.msk.f32.gmra.mrb[76].mxu0 %vm241_vm0, %v1626_v54 }
 0x262   : > { %v1590_v12 = vpop.permute.xlu0 %1589 }
 0x263   : > { %v1627_v20 = vmul.f32 %v1590_v12, %v3498_v11 }
 0x264   : > { %v1595_v14 = vpop.permute.xlu1 %1594 }
 0x265   : > { %v1628_v29 = vmul.f32 %v1595_v14, %v3501_v1  ;;  %2547 = vmatprep.mubr.msk.f32.mxu0 %vm241_vm0, %v1627_v20 }
 0x267   : > { %2548 = vmatmul.mubr.msk.f32.gmra.mrb[78].mxu0 %vm241_vm0, %v1628_v29 }
 0x2c4   : > { %v2504_v57 = vpop.f32.mrb[48].mxu0 }
 0x2c5   : > { %v1809_v18 = vadd.f32 %v2504_v57, %v3572_v47  ;;  %v1803_v21 = vpop.f32.mrb[49].mxu0 }
 0x2c6   : > { %v1804_v26 = vadd.f32 %v3572_v47, %v1803_v21 }
 0x2c7   : > { %1963 = vst [vmem:[%s3576_s24 + $0x8] sm:$0xff] %v1809_v18 }
 0x2c8   : > { %1962 = vst [vmem:[%s3576_s24] sm:$0xff] %v1804_v26 }
 0x2cc   : > { %v2507_v11 = vpop.f32.mrb[50].mxu0 }
 0x2cd   : > { %v1819_v1 = vadd.f32 %v2507_v11, %v3572_v47  ;;  %v1813_v4 = vpop.f32.mrb[51].mxu0 }
 0x2ce   : > { %v1814_v32 = vadd.f32 %v3572_v47, %v1813_v4 }
 0x2cf   : > { %1965 = vst [vmem:[%s3576_s24 + $0x18] sm:$0xff] %v1819_v1 }
 0x2d0   : > { %1964 = vst [vmem:[%s3576_s24 + $0x10] sm:$0xff] %v1814_v32 }
 0x2d2   : > { %v2510_v52 = vpop.f32.mrb[52].mxu0 }
 0x2d3   : > { %v1829_v58 = vadd.f32 %v2510_v52, %v3572_v47  ;;  %v1823_v36 = vpop.f32.mrb[53].mxu0 }
 0x2d4   : > { %v1824_v61 = vadd.f32 %v3572_v47, %v1823_v36 }
 0x2d5   : > { %1967 = vst [vmem:[%s3576_s24 + $0x28] sm:$0xff] %v1829_v58 }
 0x2d6   : > { %1966 = vst [vmem:[%s3576_s24 + $0x20] sm:$0xff] %v1824_v61 }
 0x2da   : > { %v2513_v17 = vpop.f32.mrb[54].mxu0 }
 0x2db   : > { %v1839_v27 = vadd.f32 %v2513_v17, %v3572_v47  ;;  %v1833_v63 = vpop.f32.mrb[55].mxu0 }
 0x2dc   : > { %v1834_v25 = vadd.f32 %v3572_v47, %v1833_v63 }
 0x2dd   : > { %1969 = vst [vmem:[%s3576_s24 + $0x38] sm:$0xff] %v1839_v27 }
 0x2de   : > { %1968 = vst [vmem:[%s3576_s24 + $0x30] sm:$0xff] %v1834_v25 }
 0x2e2   : > { %v2516_v42 = vpop.f32.mrb[56].mxu0 }
 0x2e3   : > { %v1849_v23 = vadd.f32 %v2516_v42, %v3572_v47  ;;  %v1843_v16 = vpop.f32.mrb[57].mxu0 }
 0x2e4   : > { %v1844_v39 = vadd.f32 %v3572_v47, %v1843_v16 }
 0x2e5   : > { %1971 = vst [vmem:[%s3576_s24 + $0x48] sm:$0xff] %v1849_v23 }
 0x2e6   : > { %1970 = vst [vmem:[%s3576_s24 + $0x40] sm:$0xff] %v1844_v39 }
 0x2ea   : > { %v2519_v13 = vpop.f32.mrb[58].mxu0 }
 0x2eb   : > { %v1859_v37 = vadd.f32 %v2519_v13, %v3572_v47  ;;  %v1853_v35 = vpop.f32.mrb[59].mxu0 }
 0x2ec   : > { %v1854_v38 = vadd.f32 %v3572_v47, %v1853_v35 }
 0x2ed   : > { %1973 = vst [vmem:[%s3576_s24 + $0x58] sm:$0xff] %v1859_v37 }
 0x2ee   : > { %1972 = vst [vmem:[%s3576_s24 + $0x50] sm:$0xff] %v1854_v38 }
 0x2f2   : > { %v2522_v45 = vpop.f32.mrb[60].mxu0 }
 0x2f3   : > { %v1869_v40 = vadd.f32 %v2522_v45, %v3572_v47  ;;  %v1863_v55 = vpop.f32.mrb[61].mxu0 }
 0x2f4   : > { %v1864_v31 = vadd.f32 %v3572_v47, %v1863_v55 }
 0x2f5   : > { %1975 = vst [vmem:[%s3576_s24 + $0x68] sm:$0xff] %v1869_v40 }
 0x2f6   : > { %1974 = vst [vmem:[%s3576_s24 + $0x60] sm:$0xff] %v1864_v31 }
 0x2fa   : > { %v2525_v19 = vpop.f32.mrb[62].mxu0 }
 0x2fb   : > { %v1879_v41 = vadd.f32 %v2525_v19, %v3572_v47  ;;  %v1873_v10 = vpop.f32.mrb[63].mxu0 }
 0x2fc   : > { %v1874_v43 = vadd.f32 %v3572_v47, %v1873_v10 }
 0x2fd   : > { %1977 = vst [vmem:[%s3576_s24 + $0x78] sm:$0xff] %v1879_v41 }
 0x2fe   : > { %1976 = vst [vmem:[%s3576_s24 + $0x70] sm:$0xff] %v1874_v43 }
 0x302   : > { %v2528_v53 = vpop.f32.mrb[64].mxu0 }
 0x303   : > { %v1889_v48 = vadd.f32 %v2528_v53, %v3572_v47  ;;  %v1883_v56 = vpop.f32.mrb[65].mxu0 }
 0x304   : > { %v1884_v50 = vadd.f32 %v3572_v47, %v1883_v56 }
 0x305   : > { %1979 = vst [vmem:[%s3576_s24 + $0x88] sm:$0xff] %v1889_v48 }
 0x306   : > { %1978 = vst [vmem:[%s3576_s24 + $0x80] sm:$0xff] %v1884_v50 }
 0x30a   : > { %v2531_v28 = vpop.f32.mrb[66].mxu0 }
 0x30b   : > { %v1899_v6 = vadd.f32 %v2531_v28, %v3572_v47  ;;  %v1893_v34 = vpop.f32.mrb[67].mxu0 }
 0x30c   : > { %v1894_v59 = vadd.f32 %v3572_v47, %v1893_v34 }
 0x30d   : > { %1981 = vst [vmem:[%s3576_s24 + $0x98] sm:$0xff] %v1899_v6 }
 0x30e   : > { %1980 = vst [vmem:[%s3576_s24 + $0x90] sm:$0xff] %v1894_v59 }
 0x312   : > { %v2534_v8 = vpop.f32.mrb[68].mxu0 }
 0x313   : > { %v1909_v60 = vadd.f32 %v2534_v8, %v3572_v47  ;;  %v1903_v62 = vpop.f32.mrb[69].mxu0 }
 0x314   : > { %v1904_v46 = vadd.f32 %v3572_v47, %v1903_v62 }
 0x315   : > { %1983 = vst [vmem:[%s3576_s24 + $0xa8] sm:$0xff] %v1909_v60 }
 0x316   : > { %1982 = vst [vmem:[%s3576_s24 + $0xa0] sm:$0xff] %v1904_v46 }
 0x31a   : > { %v2537_v44 = vpop.f32.mrb[70].mxu0 }
 0x31b   : > { %v1919_v24 = vadd.f32 %v2537_v44, %v3572_v47  ;;  %v1913_v33 = vpop.f32.mrb[71].mxu0 }
 0x31c   : > { %v1914_v51 = vadd.f32 %v3572_v47, %v1913_v33 }
 0x31d   : > { %1985 = vst [vmem:[%s3576_s24 + $0xb8] sm:$0xff] %v1919_v24 }
 0x31e   : > { %1984 = vst [vmem:[%s3576_s24 + $0xb0] sm:$0xff] %v1914_v51 }
 0x322   : > { %v2540_v0 = vpop.f32.mrb[72].mxu0 }
 0x323   : > { %v1929_v5 = vadd.f32 %v2540_v0, %v3572_v47  ;;  %v1923_v2 = vpop.f32.mrb[73].mxu0 }
 0x324   : > { %v1924_v15 = vadd.f32 %v3572_v47, %v1923_v2 }
 0x325   : > { %1987 = vst [vmem:[%s3576_s24 + $0xc8] sm:$0xff] %v1929_v5 }
 0x326   : > { %1986 = vst [vmem:[%s3576_s24 + $0xc0] sm:$0xff] %v1924_v15 }
 0x32a   : > { %v2543_v22 = vpop.f32.mrb[74].mxu0 }
 0x32b   : > { %v1939_v7 = vadd.f32 %v2543_v22, %v3572_v47  ;;  %v1933_v30 = vpop.f32.mrb[75].mxu0 }
 0x32c   : > { %v1934_v3 = vadd.f32 %v3572_v47, %v1933_v30 }
 0x32d   : > { %1989 = vst [vmem:[%s3576_s24 + $0xd8] sm:$0xff] %v1939_v7 }
 0x32e   : > { %1988 = vst [vmem:[%s3576_s24 + $0xd0] sm:$0xff] %v1934_v3 }
 0x332   : > { %v2546_v49 = vpop.f32.mrb[76].mxu0 }
 0x333   : > { %v1949_v9 = vadd.f32 %v2546_v49, %v3572_v47  ;;  %v1943_v54 = vpop.f32.mrb[77].mxu0 }
 0x334   : > { %v1944_v12 = vadd.f32 %v3572_v47, %v1943_v54 }
 0x335   : > { %1991 = vst [vmem:[%s3576_s24 + $0xe8] sm:$0xff] %v1949_v9 }
 0x336   : > { %1990 = vst [vmem:[%s3576_s24 + $0xe0] sm:$0xff] %v1944_v12 }
 0x33a   : > { %v2549_v20 = vpop.f32.mrb[78].mxu0 }
 0x33b   : > { %v1959_v14 = vadd.f32 %v2549_v20, %v3572_v47  ;;  %v1953_v29 = vpop.f32.mrb[79].mxu0 }
 0x33c   : > { %v1954_v57 = vadd.f32 %v3572_v47, %v1953_v29 }
 0x33d   : > { %1993 = vst [vmem:[%s3576_s24 + $0xf8] sm:$0xff] %v1959_v14 }
 0x33e   : > { %1992 = vst [vmem:[%s3576_s24 + $0xf0] sm:$0xff] %v1954_v57 }
 0x33f   : > { %2871 = shalt.err (!%p2868_p5)
}
 0x340   : > { %s2872_s26 = scalar_lea.hbm %s3642_s14, 4096  ;;  %s2876_s11 = scalar_lea.hbm %s3700_s4, 8192 }
 0x341   : > { %p2873_p4 = scmp.ne.s32.totalorder %s3642_s14, %s2872_s26  ;;  %p2877_p12 = scmp.lt.u32.totalorder %s3642_s14, %s3700_s4 }
 0x342   : > { %p2878_p1 = scmp.lt.u32.totalorder %s2876_s11, %s2872_s26  ;;  %p2880_p8 = scmp.lt.u32.totalorder %s2872_s26, %s3642_s14 }
 0x343   : > { %p2874_p7 = pnand %p2873_p4, %p3708_p9 }
 0x344   : > { %p2879_p3 = por %p2878_p1, %p2877_p12 }
 0x345   : > { %p2875_p10 = pneg %p2874_p7 }
 0x346   : > { %p2881_p11 = por %p2880_p8, %p2879_p3 }
 0x348   : > { %p2882_p0 = pnand %p2881_p11, %p2875_p10 }
 0x34a   : > { %2885 = shalt.err (!%p2882_p0)
}
 0x34b   : > { %s2948_s25 = smov 128   ;;  %s2949_s12 = smov 8  }
 0x34c   : > { %2568 = dma.vmem_to_hbm [thread:$0]  (%p3708_p9), %s3644_s10, 4096, %s3642_s14, %s1995_s18, %s2948_s25, %s2948_s25, %s2949_s12  }
 0x34d PF: > { %s2023_s13 = sand.u32 1, %s2920_s15   ;;  %p3709_p6 = scmp.ne.s32.totalorder %s3705_s30, 0 }
 0x34e   : > { %p3710_p13 = scmp.ge.s32.totalorder %s2940_s20, 2  ;;  %s2024_s6 = scalar_lea.sflag [#allocation5], %s2023_s13 }
 0x350   : > { %p2575_p2 = pnand %p3710_p13, %p3709_p6 }
 0x352   : > { %2915 = dma.done.wait (!%p2575_p2), %s2024_s6, 4096  }
 0x353   : > { %2917 = vsyncadd (!%p2575_p2), %s2024_s6, 4294963200  ;;  %s20_s20 = sadd.s32 1, %s2940_s20   ;;  %s3711_s15 = smov %s2924_s16 }
 0x354   : > { %p17_p5 = scmp.ge.s32.totalorder %s20_s20, 4   ;;  %s3712_s16 = smov %s2928_s17 }
 0x355   : > { %s3713_s17 = smov %s3031_s29  ;;  %s3714_s18 = smov %s2936_s19 }
 0x356   : > { %s3715_s19 = smov %s3717_s23  ;;  %19 = sbr.rel (!%p17_p5) target bundleno = 6 (0x6), region = 90 }
 0x35d   :  { %2029 = vsyncpa [#allocation4], 1 }
 0x35e   :  { %2031 = vsyncpa [#allocation4 + $0x1], 1 }
 0x35f   :  { %2032 = vsyncpa [#allocation5], 1 }
 0x360   :  { %2034 = vsyncpa [#allocation5 + $0x1], 1 }

</bundles_post_ra>
